<compile_context>
chip_gen: v6e
topology: v6e:2x2x1
jax: 0.10.0
libtpu: 0.0.40
codegen_flags: <defaults>
</compile_context>

<pallas_src>
import functools

import jax
import jax.numpy as jnp
from jax.experimental import pallas as pl
from jax.experimental.pallas import tpu as pltpu

# ----------------------------- model dims (from the PyTorch module) ----------
LAYER_DIMS = [784, 512, 256, 128, 64, 10]
H4_PAD = 128   # layer-4 output padded 64 -> 128 (lane-dense, K=128 final matmul)
N_PAD = 128    # final logits padded 10 -> 128 (lane-dense unmasked stores)


def _round_up(x, m):
    return ((x + m - 1) // m) * m


def _activation(h, kind):
    if kind == "ReLU":
        return jnp.maximum(h, 0.0)
    if kind == "Sigmoid":
        return jax.nn.sigmoid(h)
    if kind == "Tanh":
        return jnp.tanh(h)
    raise ValueError(kind)


def _mlp_softmax_kernel(x_ref,
                        w1_ref, b1_ref,
                        w2_ref, b2_ref,
                        w3_ref, b3_ref,
                        w4_ref, b4_ref,
                        w5_ref, b5_ref,
                        out_ref, *, activation):
    """Fused 5-layer MLP + softmax for one batch tile.

    x tile is (TB, 784) f32 straight from HBM; weights are bf16, biases f32.
    All matmuls feed the MXU in bf16 with fp32 accumulation; activations and
    the softmax are computed in f32.
    """
    # f32 -> bf16 cast in-kernel: free VPU filler under the MXU-bound tile.
    h = x_ref[...].astype(jnp.bfloat16)            # (TB, 784)

    def hidden_layer(h_bf16, w_ref, b_ref):
        y = jnp.dot(h_bf16, w_ref[...],
                    preferred_element_type=jnp.float32) + b_ref[...]
        return _activation(y, activation).astype(jnp.bfloat16)

    h = hidden_layer(h, w1_ref, b1_ref)            # (TB, 512)
    h = hidden_layer(h, w2_ref, b2_ref)            # (TB, 256)
    h = hidden_layer(h, w3_ref, b3_ref)            # (TB, 128)
    h = hidden_layer(h, w4_ref, b4_ref)            # (TB, 128): 64 real + 64 pad

    # Final layer.  Padded W5 *rows* are zero, so activation(0) on the padded
    # h4 columns (0.5 for Sigmoid) contributes nothing.  Padded logit columns
    # carry a -1e30 bias so exp() underflows to exactly 0 and the softmax
    # denominator is unaffected.
    logits = jnp.dot(h, w5_ref[...],
                     preferred_element_type=jnp.float32) + b5_ref[...]

    # Softmax(dim=1) -- numerically stable; divide on the EUP reciprocal slot.
    m = jnp.max(logits, axis=-1, keepdims=True)
    e = jnp.exp(logits - m)
    denom = jnp.sum(e, axis=-1, keepdims=True)
    out_ref[...] = e * pl.reciprocal(denom, approx=True)


def net_fc_forward(x_nchw, params, *, activation="ReLU", batch_tile=512):
    """Forward pass of Net(activation, 'FC').

    x_nchw: (B, 1, 28, 28) float32, NCHW like PyTorch.
    params: list of (W, b) with W of shape (in, out), b of shape (1, out), fp32.
    returns: (B, 10) softmax probabilities (float32).
    """
    B = x_nchw.shape[0]
    x = x_nchw.reshape(B, -1).astype(jnp.float32)      # torch.nn.Flatten()
    K = LAYER_DIMS[0]
    assert x.shape[1] == K

    # --- batch tiling --------------------------------------------------------
    batch_tile = max(16, _round_up(batch_tile, 16))
    TB = min(batch_tile, _round_up(B, 16))             # 16: bf16 sublane packing
    if B >= 256 and pl.cdiv(B, TB) < 2:
        # >=2 grid steps so the "parallel" batch axis can shard across the two
        # TensorCores on v7x (harmless elsewhere: one extra ~0.35us grid step).
        TB = _round_up(pl.cdiv(B, 2), 16)
    num_tiles = pl.cdiv(B, TB)
    # No wrapper-side batch padding: the boundary tile's DMA is clamped by
    # Pallas (garbage rows compute but their output writes are discarded), so
    # there is no extra HBM pass on x and no up-to-TB-1 rows of wasted work.

    # --- weights: bf16 for the MXU, f32 biases; lane-dense padding ----------
    (w1, b1), (w2, b2), (w3, b3), (w4, b4), (w5, b5) = params
    d4, d5 = LAYER_DIMS[4], LAYER_DIMS[5]               # 64, 10
    w1p = w1.astype(jnp.bfloat16)
    w2p = w2.astype(jnp.bfloat16)
    w3p = w3.astype(jnp.bfloat16)
    # Layer 4: pad output 64 -> 128 with zero columns / zero bias.
    w4p = jnp.pad(w4, ((0, 0), (0, H4_PAD - d4))).astype(jnp.bfloat16)
    b4p = jnp.pad(b4.astype(jnp.float32), ((0, 0), (0, H4_PAD - d4)))
    # Layer 5: zero rows for the padded h4 columns (must stay exactly zero so
    # Sigmoid(0)=0.5 on the pad is harmless); zero columns + -1e30 bias for the
    # padded logits so their softmax probability is exactly 0.
    w5p = jnp.pad(w5, ((0, H4_PAD - d4), (0, N_PAD - d5))).astype(jnp.bfloat16)
    b5p = jnp.pad(b5.astype(jnp.float32), ((0, 0), (0, N_PAD - d5)),
                  constant_values=-1e30)

    flat_params = [w1p, b1.astype(jnp.float32),
                   w2p, b2.astype(jnp.float32),
                   w3p, b3.astype(jnp.float32),
                   w4p, b4p,
                   w5p, b5p]

    kernel = functools.partial(_mlp_softmax_kernel, activation=activation)

    # --- specs ---------------------------------------------------------------
    # x / out are tiled along the batch axis; every weight/bias keeps block
    # index (0, 0) so it stays resident in VMEM across all grid iterations.
    in_specs = [pl.BlockSpec((TB, K), lambda i: (i, 0))]
    for p in flat_params:
        in_specs.append(pl.BlockSpec(p.shape, lambda i: (0, 0)))
    out_specs = pl.BlockSpec((TB, N_PAD), lambda i: (i, 0))

    # --- advisory cost estimate ----------------------------------------------
    mm_dims = [(K, 512), (512, 256), (256, 128), (128, H4_PAD), (H4_PAD, N_PAD)]
    rows = num_tiles * TB
    flops = 2 * rows * sum(k * n for k, n in mm_dims)
    transcendentals = rows * N_PAD                      # softmax exp
    if activation in ("Sigmoid", "Tanh"):
        transcendentals += rows * sum(n for _, n in mm_dims[:-1])
    bytes_accessed = (int(x.size) * 4
                      + sum(int(p.size) * p.dtype.itemsize for p in flat_params)
                      + B * N_PAD * 4)
    cost = pl.CostEstimate(flops=int(flops),
                           transcendentals=int(transcendentals),
                           bytes_accessed=int(bytes_accessed))

    out = pl.pallas_call(
        kernel,
        out_shape=jax.ShapeDtypeStruct((B, N_PAD), jnp.float32),
        grid=(num_tiles,),
        in_specs=in_specs,
        out_specs=out_specs,
        compiler_params=pltpu.CompilerParams(
            dimension_semantics=("parallel",)),
        # NOTE: default scoped VMEM is plenty at TB<=512 on all chips; pushing
        # batch_tile to >=1024 on v5e may need vmem_limit_bytes=...
        cost_estimate=cost,
    )(x, *flat_params)

    return out[:, :d5]


def init_params(key):
    """Deterministic synthetic parameters matching the FC layer shapes (fp32)."""
    params = []
    for i in range(len(LAYER_DIMS) - 1):
        fan_in, fan_out = LAYER_DIMS[i], LAYER_DIMS[i + 1]
        key, kw, kb = jax.random.split(key, 3)
        scale = 1.0 / jnp.sqrt(jnp.float32(fan_in))
        w = jax.random.uniform(kw, (fan_in, fan_out), jnp.float32, -scale, scale)
        b = jax.random.uniform(kb, (1, fan_out), jnp.float32, -scale, scale)
        params.append((w, b))
    return params


def reference_forward(x_nchw, params, *, activation="ReLU"):
    """Pure-JAX fp32 reference for validation."""
    h = x_nchw.reshape(x_nchw.shape[0], -1)
    for i, (w, b) in enumerate(params):
        h = h @ w + b
        if i < len(params) - 1:
            h = _activation(h, activation)
    return jax.nn.softmax(h, axis=1)


if __name__ == "__main__":
    key = jax.random.PRNGKey(0)
    key, kx = jax.random.split(key)

    # MNIST-like small batch: (B, 1, 28, 28) NCHW.
    B = 8
    x = jax.random.normal(kx, (B, 1, 28, 28), jnp.float32)
    params = init_params(key)

    for act in ("ReLU", "Sigmoid", "Tanh"):
        out = jax.block_until_ready(net_fc_forward(x, params, activation=act))
        ref = reference_forward(x, params, activation=act)
        assert out.shape == (B, 10), act
        # Rows must sum to 1 (softmax; approx reciprocal error ~1e-3) and match
        # the fp32 reference to bf16-matmul accuracy.
        assert jnp.allclose(jnp.sum(out, axis=1), 1.0, atol=5e-3), act
        assert jnp.allclose(out, ref, atol=3e-2, rtol=3e-2), act

    # Multi-tile grid with a partial boundary tile (also exercises the
    # two-tile split used for v7x TensorCore sharding).
    key, kx2 = jax.random.split(key)
    B2 = 300
    x2 = jax.random.normal(kx2, (B2, 1, 28, 28), jnp.float32)
    out2 = jax.block_until_ready(net_fc_forward(x2, params, activation="ReLU"))
    ref2 = reference_forward(x2, params, activation="ReLU")
    assert out2.shape == (B2, 10)
    assert jnp.allclose(jnp.sum(out2, axis=1), 1.0, atol=5e-3)
    assert jnp.allclose(out2, ref2, atol=3e-2, rtol=3e-2)

    print("KERNEL_OK")
</pallas_src>

<mosaic_0001>
module attributes {stable_mosaic.version = 11 : i64} {
  func.func @_mlp_softmax_kernel(%arg0: i32, %arg1: memref<16x784xf32, #tpu.memory_space<vmem>>, %arg2: memref<784x512xbf16, #tpu.memory_space<vmem>>, %arg3: memref<1x512xf32, #tpu.memory_space<vmem>>, %arg4: memref<512x256xbf16, #tpu.memory_space<vmem>>, %arg5: memref<1x256xf32, #tpu.memory_space<vmem>>, %arg6: memref<256x128xbf16, #tpu.memory_space<vmem>>, %arg7: memref<1x128xf32, #tpu.memory_space<vmem>>, %arg8: memref<128x128xbf16, #tpu.memory_space<vmem>>, %arg9: memref<1x128xf32, #tpu.memory_space<vmem>>, %arg10: memref<128x128xbf16, #tpu.memory_space<vmem>>, %arg11: memref<1x128xf32, #tpu.memory_space<vmem>>, %arg12: memref<16x128xf32, #tpu.memory_space<vmem>>) attributes {dimension_semantics = [#tpu.dimension_semantics<parallel>], iteration_bounds = array<i64: 1>, scalar_prefetch = 0 : i64, scratch_operands = 0 : i64, tpu.core_type = #tpu.core_type<tc>, window_params = [{transform_indices = @transform_0, window_bounds = array<i64: 16, 784>}, {pipeline_mode = #tpu.pipeline_mode<synchronous>, transform_indices = @transform_1, window_bounds = array<i64: 784, 512>}, {pipeline_mode = #tpu.pipeline_mode<synchronous>, transform_indices = @transform_2, window_bounds = array<i64: 1, 512>}, {pipeline_mode = #tpu.pipeline_mode<synchronous>, transform_indices = @transform_3, window_bounds = array<i64: 512, 256>}, {pipeline_mode = #tpu.pipeline_mode<synchronous>, transform_indices = @transform_4, window_bounds = array<i64: 1, 256>}, {pipeline_mode = #tpu.pipeline_mode<synchronous>, transform_indices = @transform_5, window_bounds = array<i64: 256, 128>}, {pipeline_mode = #tpu.pipeline_mode<synchronous>, transform_indices = @transform_6, window_bounds = array<i64: 1, 128>}, {pipeline_mode = #tpu.pipeline_mode<synchronous>, transform_indices = @transform_7, window_bounds = array<i64: 128, 128>}, {pipeline_mode = #tpu.pipeline_mode<synchronous>, transform_indices = @transform_8, window_bounds = array<i64: 1, 128>}, {pipeline_mode = #tpu.pipeline_mode<synchronous>, transform_indices = @transform_9, window_bounds = array<i64: 128, 128>}, {pipeline_mode = #tpu.pipeline_mode<synchronous>, transform_indices = @transform_10, window_bounds = array<i64: 1, 128>}, {transform_indices = @transform_11, window_bounds = array<i64: 16, 128>}]} {
    %c0 = arith.constant 0 : index
    %c0_0 = arith.constant 0 : index
    %0 = vector.load %arg1[%c0, %c0_0] : memref<16x784xf32, #tpu.memory_space<vmem>>, vector<16x784xf32>
    %1 = arith.truncf %0 : vector<16x784xf32> to vector<16x784xbf16>
    %c0_1 = arith.constant 0 : index
    %c0_2 = arith.constant 0 : index
    %2 = vector.load %arg2[%c0_1, %c0_2] : memref<784x512xbf16, #tpu.memory_space<vmem>>, vector<784x512xbf16>
    %cst = arith.constant dense<0.000000e+00> : vector<16x512xf32>
    %3 = tpu.matmul %1, %2, %cst {dimension_numbers = #tpu.dot_dimension_numbers<[1], [0], [0], [1], [0, 0, 1, 1], [], []>} : vector<16x784xbf16>, vector<784x512xbf16>, vector<16x512xf32> -> vector<16x512xf32>
    %c0_3 = arith.constant 0 : index
    %c0_4 = arith.constant 0 : index
    %4 = vector.load %arg3[%c0_3, %c0_4] : memref<1x512xf32, #tpu.memory_space<vmem>>, vector<1x512xf32>
    %5 = vector.broadcast %4 : vector<1x512xf32> to vector<16x512xf32>
    %6 = arith.addf %3, %5 : vector<16x512xf32>
    %cst_5 = arith.constant 0.000000e+00 : f32
    %7 = vector.broadcast %cst_5 : f32 to vector<16x512xf32>
    %8 = arith.maximumf %6, %7 : vector<16x512xf32>
    %9 = arith.truncf %8 : vector<16x512xf32> to vector<16x512xbf16>
    %c0_6 = arith.constant 0 : index
    %c0_7 = arith.constant 0 : index
    %10 = vector.load %arg4[%c0_6, %c0_7] : memref<512x256xbf16, #tpu.memory_space<vmem>>, vector<512x256xbf16>
    %cst_8 = arith.constant dense<0.000000e+00> : vector<16x256xf32>
    %11 = tpu.matmul %9, %10, %cst_8 {dimension_numbers = #tpu.dot_dimension_numbers<[1], [0], [0], [1], [0, 0, 1, 1], [], []>} : vector<16x512xbf16>, vector<512x256xbf16>, vector<16x256xf32> -> vector<16x256xf32>
    %c0_9 = arith.constant 0 : index
    %c0_10 = arith.constant 0 : index
    %12 = vector.load %arg5[%c0_9, %c0_10] : memref<1x256xf32, #tpu.memory_space<vmem>>, vector<1x256xf32>
    %13 = vector.broadcast %12 : vector<1x256xf32> to vector<16x256xf32>
    %14 = arith.addf %11, %13 : vector<16x256xf32>
    %cst_11 = arith.constant 0.000000e+00 : f32
    %15 = vector.broadcast %cst_11 : f32 to vector<16x256xf32>
    %16 = arith.maximumf %14, %15 : vector<16x256xf32>
    %17 = arith.truncf %16 : vector<16x256xf32> to vector<16x256xbf16>
    %c0_12 = arith.constant 0 : index
    %c0_13 = arith.constant 0 : index
    %18 = vector.load %arg6[%c0_12, %c0_13] : memref<256x128xbf16, #tpu.memory_space<vmem>>, vector<256x128xbf16>
    %cst_14 = arith.constant dense<0.000000e+00> : vector<16x128xf32>
    %19 = tpu.matmul %17, %18, %cst_14 {dimension_numbers = #tpu.dot_dimension_numbers<[1], [0], [0], [1], [0, 0, 1, 1], [], []>} : vector<16x256xbf16>, vector<256x128xbf16>, vector<16x128xf32> -> vector<16x128xf32>
    %c0_15 = arith.constant 0 : index
    %c0_16 = arith.constant 0 : index
    %20 = vector.load %arg7[%c0_15, %c0_16] : memref<1x128xf32, #tpu.memory_space<vmem>>, vector<1x128xf32>
    %21 = vector.broadcast %20 : vector<1x128xf32> to vector<16x128xf32>
    %22 = arith.addf %19, %21 : vector<16x128xf32>
    %cst_17 = arith.constant 0.000000e+00 : f32
    %23 = vector.broadcast %cst_17 : f32 to vector<16x128xf32>
    %24 = arith.maximumf %22, %23 : vector<16x128xf32>
    %25 = arith.truncf %24 : vector<16x128xf32> to vector<16x128xbf16>
    %c0_18 = arith.constant 0 : index
    %c0_19 = arith.constant 0 : index
    %26 = vector.load %arg8[%c0_18, %c0_19] : memref<128x128xbf16, #tpu.memory_space<vmem>>, vector<128x128xbf16>
    %cst_20 = arith.constant dense<0.000000e+00> : vector<16x128xf32>
    %27 = tpu.matmul %25, %26, %cst_20 {dimension_numbers = #tpu.dot_dimension_numbers<[1], [0], [0], [1], [0, 0, 1, 1], [], []>} : vector<16x128xbf16>, vector<128x128xbf16>, vector<16x128xf32> -> vector<16x128xf32>
    %c0_21 = arith.constant 0 : index
    %c0_22 = arith.constant 0 : index
    %28 = vector.load %arg9[%c0_21, %c0_22] : memref<1x128xf32, #tpu.memory_space<vmem>>, vector<1x128xf32>
    %29 = vector.broadcast %28 : vector<1x128xf32> to vector<16x128xf32>
    %30 = arith.addf %27, %29 : vector<16x128xf32>
    %cst_23 = arith.constant 0.000000e+00 : f32
    %31 = vector.broadcast %cst_23 : f32 to vector<16x128xf32>
    %32 = arith.maximumf %30, %31 : vector<16x128xf32>
    %33 = arith.truncf %32 : vector<16x128xf32> to vector<16x128xbf16>
    %c0_24 = arith.constant 0 : index
    %c0_25 = arith.constant 0 : index
    %34 = vector.load %arg10[%c0_24, %c0_25] : memref<128x128xbf16, #tpu.memory_space<vmem>>, vector<128x128xbf16>
    %cst_26 = arith.constant dense<0.000000e+00> : vector<16x128xf32>
    %35 = tpu.matmul %33, %34, %cst_26 {dimension_numbers = #tpu.dot_dimension_numbers<[1], [0], [0], [1], [0, 0, 1, 1], [], []>} : vector<16x128xbf16>, vector<128x128xbf16>, vector<16x128xf32> -> vector<16x128xf32>
    %c0_27 = arith.constant 0 : index
    %c0_28 = arith.constant 0 : index
    %36 = vector.load %arg11[%c0_27, %c0_28] : memref<1x128xf32, #tpu.memory_space<vmem>>, vector<1x128xf32>
    %37 = vector.broadcast %36 : vector<1x128xf32> to vector<16x128xf32>
    %38 = arith.addf %35, %37 : vector<16x128xf32>
    %cst_29 = arith.constant dense<0xFF800000> : vector<16xf32>
    %39 = vector.multi_reduction <maximumf>, %38, %cst_29 [1] : vector<16x128xf32> to vector<16xf32>
    %40 = vector.shape_cast %39 : vector<16xf32> to vector<16x1xf32>
    %41 = vector.broadcast %40 : vector<16x1xf32> to vector<16x128xf32>
    %42 = arith.subf %38, %41 : vector<16x128xf32>
    %43 = math.exp %42 : vector<16x128xf32>
    %cst_30 = arith.constant dense<0.000000e+00> : vector<16xf32>
    %44 = vector.multi_reduction <add>, %43, %cst_30 [1] : vector<16x128xf32> to vector<16xf32>
    %45 = vector.shape_cast %44 : vector<16xf32> to vector<16x1xf32>
    %46 = tpu.reciprocal %45 {approx = true} : vector<16x1xf32> -> vector<16x1xf32>
    %47 = vector.broadcast %46 : vector<16x1xf32> to vector<16x128xf32>
    %48 = arith.mulf %43, %47 : vector<16x128xf32>
    %c0_31 = arith.constant 0 : index
    %c0_32 = arith.constant 0 : index
    %49 = vector.load %arg12[%c0_31, %c0_32] : memref<16x128xf32, #tpu.memory_space<vmem>>, vector<16x128xf32>
    tpu.vector_store %arg12[%c0_31, %c0_32], %48 {strides = array<i32>} : memref<16x128xf32, #tpu.memory_space<vmem>>, vector<16x128xf32>,
    return
  }
  func.func @transform_0(%arg0: i32) -> (i32, i32) {
    %c0_i32 = arith.constant 0 : i32
    %c0_i32_0 = arith.constant 0 : i32
    return %arg0, %c0_i32 : i32, i32
  }
  func.func @transform_1(%arg0: i32) -> (i32, i32) {
    %c0_i32 = arith.constant 0 : i32
    %c0_i32_0 = arith.constant 0 : i32
    %c0_i32_1 = arith.constant 0 : i32
    return %c0_i32, %c0_i32_0 : i32, i32
  }
  func.func @transform_2(%arg0: i32) -> (i32, i32) {
    %c0_i32 = arith.constant 0 : i32
    %c0_i32_0 = arith.constant 0 : i32
    %c0_i32_1 = arith.constant 0 : i32
    return %c0_i32, %c0_i32_0 : i32, i32
  }
  func.func @transform_3(%arg0: i32) -> (i32, i32) {
    %c0_i32 = arith.constant 0 : i32
    %c0_i32_0 = arith.constant 0 : i32
    %c0_i32_1 = arith.constant 0 : i32
    return %c0_i32, %c0_i32_0 : i32, i32
  }
  func.func @transform_4(%arg0: i32) -> (i32, i32) {
    %c0_i32 = arith.constant 0 : i32
    %c0_i32_0 = arith.constant 0 : i32
    %c0_i32_1 = arith.constant 0 : i32
    return %c0_i32, %c0_i32_0 : i32, i32
  }
  func.func @transform_5(%arg0: i32) -> (i32, i32) {
    %c0_i32 = arith.constant 0 : i32
    %c0_i32_0 = arith.constant 0 : i32
    %c0_i32_1 = arith.constant 0 : i32
    return %c0_i32, %c0_i32_0 : i32, i32
  }
  func.func @transform_6(%arg0: i32) -> (i32, i32) {
    %c0_i32 = arith.constant 0 : i32
    %c0_i32_0 = arith.constant 0 : i32
    %c0_i32_1 = arith.constant 0 : i32
    return %c0_i32, %c0_i32_0 : i32, i32
  }
  func.func @transform_7(%arg0: i32) -> (i32, i32) {
    %c0_i32 = arith.constant 0 : i32
    %c0_i32_0 = arith.constant 0 : i32
    %c0_i32_1 = arith.constant 0 : i32
    return %c0_i32, %c0_i32_0 : i32, i32
  }
  func.func @transform_8(%arg0: i32) -> (i32, i32) {
    %c0_i32 = arith.constant 0 : i32
    %c0_i32_0 = arith.constant 0 : i32
    %c0_i32_1 = arith.constant 0 : i32
    return %c0_i32, %c0_i32_0 : i32, i32
  }
  func.func @transform_9(%arg0: i32) -> (i32, i32) {
    %c0_i32 = arith.constant 0 : i32
    %c0_i32_0 = arith.constant 0 : i32
    %c0_i32_1 = arith.constant 0 : i32
    return %c0_i32, %c0_i32_0 : i32, i32
  }
  func.func @transform_10(%arg0: i32) -> (i32, i32) {
    %c0_i32 = arith.constant 0 : i32
    %c0_i32_0 = arith.constant 0 : i32
    %c0_i32_1 = arith.constant 0 : i32
    return %c0_i32, %c0_i32_0 : i32, i32
  }
  func.func @transform_11(%arg0: i32) -> (i32, i32) {
    %c0_i32 = arith.constant 0 : i32
    %c0_i32_0 = arith.constant 0 : i32
    return %arg0, %c0_i32 : i32, i32
  }
}

</mosaic_0001>

<bundles_post_ra>
// kernel: tpu_custom_call.1
= control target key start
LH: loop header
LB: loop body
LE: loop exit
PB: predicated region body
PF: predicated region fallthrough
CT: control target
= control target key end

     0   :  { %16 = vsyncpa [#allocation3], 0  ;;  %s3836_s0 = inlined_call_operand.hbm [shape: f32[8,784], index: 0, kind: input, shape index: {}]   ;;  %s3837_s1 = inlined_call_operand.hbm [shape: bf16[784,512], index: 1, kind: input, shape index: {}]   ;;  %s3838_s2 = inlined_call_operand.hbm [shape: f32[1,512], index: 2, kind: input, shape index: {}]   ;;  %s3839_s3 = inlined_call_operand.hbm [shape: bf16[512,256], index: 3, kind: input, shape index: {}]   ;;  %s3840_s4 = inlined_call_operand.vmem [shape: f32[1,256], index: 4, kind: input, shape index: {}]   ;;  %s3841_s5 = inlined_call_operand.hbm [shape: bf16[256,128], index: 5, kind: input, shape index: {}]   ;;  %s3842_s6 = inlined_call_operand.vmem [shape: f32[1,128], index: 6, kind: input, shape index: {}]   ;;  %s3843_s7 = inlined_call_operand.hbm [shape: bf16[128,128], index: 7, kind: input, shape index: {}]   ;;  %s3844_s8 = inlined_call_operand.vmem [shape: f32[1,128], index: 8, kind: input, shape index: {}]   ;;  %s3845_s9 = inlined_call_operand.hbm [shape: bf16[128,128], index: 9, kind: input, shape index: {}]   ;;  %s3846_s10 = inlined_call_operand.vmem [shape: f32[1,128], index: 10, kind: input, shape index: {}]   ;;  %s3847_s11 = inlined_call_operand.hbm [shape: f32[8,128], index: 11, kind: output, shape index: {}]  }
   0x1   :  { %17 = vsyncpa [#allocation6], 0 }
   0x2   :  { %18 = vsyncpa [#allocation9], 0 }
   0x3   :  { %19 = vsyncpa [#allocation12], 0 }
   0x4   :  { %20 = vsyncpa [#allocation4], 0 }
   0x5   :  { %25 = vsyncadd [#allocation3], 896  ;;  %s3642_s17 = smov [#allocation5]  }
   0x6   :  { %s38_s18 = sshll.u32 %s3642_s17, 4  ;;  %s39_s18 = int_to_ptr.vmem [resolvable:$true] %s38_s18 }
   0x7   :  { %s3480_s19 = scalar_lea.vmem %s39_s18, 25088  ;;  %p3485_p1 = scmp.lt.s32.totalorder %s39_s18, %s39_s18 }
   0x8   :  { %p3481_p0 = scmp.ne.s32.totalorder %s39_s18, %s3480_s19  ;;  %p3486_p2 = scmp.lt.s32.totalorder %s3480_s19, %s3480_s19 }
   0xa   :  { %p3487_p3 = por %p3486_p2, %p3485_p1 }
   0xc   :  { %p3488_p4 = pnand %p3487_p3, %p3481_p0 }
   0xe   :  { %3491 = shalt.err (!%p3488_p4)
}
   0xf   :  { %s3643_s20 = smov 256   ;;  %s3644_s21 = smov 16  }
  0x10   :  { %44 = dma.hbm_to_vmem [thread:$0]  %s3837_s1, 25088, %s39_s18, [#allocation6], %s3643_s20, %s3643_s20, %s3644_s21  }
  0x11   :  { %s3645_s24 = smov [#allocation8]  }
  0x12   :  { %s60_s25 = sshll.u32 %s3645_s24, 4  ;;  %s61_s25 = int_to_ptr.vmem [resolvable:$true] %s60_s25 }
  0x13   :  { %s3500_s26 = scalar_lea.vmem %s61_s25, 8192  ;;  %p3505_p6 = scmp.lt.s32.totalorder %s61_s25, %s61_s25 }
  0x14   :  { %p3501_p5 = scmp.ne.s32.totalorder %s61_s25, %s3500_s26  ;;  %p3506_p7 = scmp.lt.s32.totalorder %s3500_s26, %s3500_s26 }
  0x16   :  { %p3507_p8 = por %p3506_p7, %p3505_p6 }
  0x18   :  { %p3508_p9 = pnand %p3507_p8, %p3501_p5 }
  0x1a   :  { %3511 = shalt.err (!%p3508_p9)
}
  0x1b   :  { %s3646_s27 = smov 128   ;;  %s3647_s28 = smov 8  }
  0x1c   :  { %66 = dma.hbm_to_vmem [thread:$0]  %s3839_s3, 8192, %s61_s25, [#allocation9], %s3646_s27, %s3646_s27, %s3647_s28  }
  0x1d   :  { %s3648_s1 = smov [#allocation11]   ;;  %s3649_s13 = smov [#allocation2]  }
  0x1e   :  { %s88_s12 = sshll.u32 %s3648_s1, 4  ;;  %s26_s14 = sshll.u32 %s3649_s13, 4  ;;  %s89_s12 = int_to_ptr.vmem [resolvable:$true] %s88_s12  ;;  %s27_s14 = int_to_ptr.vmem [resolvable:$true] %s26_s14 }
  0x1f   :  { %s3520_s15 = scalar_lea.vmem %s89_s12, 1024  ;;  %p3525_p11 = scmp.lt.s32.totalorder %s89_s12, %s89_s12 }
  0x20   :  { %p3521_p10 = scmp.ne.s32.totalorder %s89_s12, %s3520_s15  ;;  %p3526_p12 = scmp.lt.s32.totalorder %s3520_s15, %s3520_s15 }
  0x22   :  { %p3527_p13 = por %p3526_p12, %p3525_p11 }
  0x24   :  { %p3528_p0 = pnand %p3527_p13, %p3521_p10 }
  0x26   :  { %3531 = shalt.err (!%p3528_p0)
}
  0x27   :  { %s3650_s16 = smov 64   ;;  %s3651_s17 = smov 4  }
  0x28   :  { %94 = dma.hbm_to_vmem [thread:$0]  %s3843_s7, 1024, %s89_s12, [#allocation12], %s3650_s16, %s3650_s16, %s3651_s17  }
  0x29   :  { %s3540_s19 = scalar_lea.vmem %s27_s14, 896  ;;  %s3544_s20 = scalar_lea.vmem %s27_s14, 1792 }
  0x2a   :  { %p3541_p1 = scmp.ne.s32.totalorder %s27_s14, %s3540_s19  ;;  %p3545_p2 = scmp.lt.s32.totalorder %s27_s14, %s27_s14 }
  0x2b   :  { %p3546_p3 = scmp.lt.s32.totalorder %s3544_s20, %s3540_s19 }
  0x2d   :  { %p3547_p4 = por %p3546_p3, %p3545_p2 }
  0x2f   :  { %p3548_p5 = pnand %p3547_p4, %p3541_p1 }
  0x31   :  { %3551 = shalt.err (!%p3548_p5)
}
  0x32   :  { %s3652_s21 = smov 896   ;;  %s3653_s22 = smov 56  }
  0x33   :  { %32 = dma.hbm_to_vmem [thread:$0]  %s3836_s0, 896, %s27_s14, [#allocation3], %s3652_s21, %s3652_s21, %s3653_s22  }
  0x34   :  { %s3654_s25 = smov [#allocation7]   ;;  %s3655_s29 = smov [#allocation10]  }
  0x35   :  { %s51_s26 = sshll.u32 %s3654_s25, 4  ;;  %s74_s30 = sshll.u32 %s3655_s29, 4  ;;  %s52_s26 = int_to_ptr.vmem [resolvable:$true] %s51_s26  ;;  %s75_s30 = int_to_ptr.vmem [resolvable:$true] %s74_s30 }
  0x36   :  { %s3560_s7 = scalar_lea.vmem %s52_s26, 64  ;;  %p3565_p7 = scmp.lt.s32.totalorder %s52_s26, %s52_s26 }
  0x37   :  { %p3561_p6 = scmp.ne.s32.totalorder %s52_s26, %s3560_s7  ;;  %p3566_p8 = scmp.lt.s32.totalorder %s3560_s7, %s3560_s7 }
  0x39   :  { %p3567_p9 = por %p3566_p8, %p3565_p7 }
  0x3b   :  { %p3568_p10 = pnand %p3567_p9, %p3561_p6 }
  0x3d   :  { %3571 = shalt.err (!%p3568_p10)
}
  0x3e   :  { %54 = dma.hbm_to_vmem [thread:$0]  %s3838_s2, 64, %s52_s26, [#allocation6]  }
  0x3f   :  { %s3580_s13 = scalar_lea.vmem %s75_s30, 2048  ;;  %p3585_p12 = scmp.lt.s32.totalorder %s75_s30, %s75_s30 }
  0x40   :  { %p3581_p11 = scmp.ne.s32.totalorder %s75_s30, %s3580_s13  ;;  %p3586_p13 = scmp.lt.s32.totalorder %s3580_s13, %s3580_s13 }
  0x42   :  { %p3587_p0 = por %p3586_p13, %p3585_p12 }
  0x44   :  { %p3588_p1 = pnand %p3587_p0, %p3581_p11 }
  0x46   :  { %3591 = shalt.err (!%p3588_p1)
}
  0x47   :  { %80 = dma.hbm_to_vmem [thread:$0]  %s3841_s5, 2048, %s75_s30, [#allocation9], %s3650_s16, %s3650_s16, %s3651_s17  }
  0x48   :  { %s3656_s15 = smov [#allocation13]  }
  0x49   :  { %s102_s18 = sshll.u32 %s3656_s15, 4  ;;  %s103_s18 = int_to_ptr.vmem [resolvable:$true] %s102_s18 }
  0x4a   :  { %s3600_s3 = scalar_lea.vmem %s103_s18, 1024  ;;  %p3605_p3 = scmp.lt.s32.totalorder %s103_s18, %s103_s18 }
  0x4b   :  { %p3601_p2 = scmp.ne.s32.totalorder %s103_s18, %s3600_s3  ;;  %p3606_p4 = scmp.lt.s32.totalorder %s3600_s3, %s3600_s3 }
  0x4d   :  { %p3607_p5 = por %p3606_p4, %p3605_p3 }
  0x4f   :  { %p3608_p6 = pnand %p3607_p5, %p3601_p2 }
  0x51   :  { %3611 = shalt.err (!%p3608_p6)
}
  0x52   :  { %108 = dma.hbm_to_vmem [thread:$0]  %s3845_s9, 1024, %s103_s18, [#allocation12], %s3650_s16, %s3650_s16, %s3651_s17  }
  0x53   :  { %3632 = dma.done.wait [#allocation3], 1792  }
  0x54   :  { %3633 = vsyncadd [#allocation3], 4294965504 }
  0x55   :  { %3634 = dma.done.wait [#allocation6], 25152  }
  0x56   :  { %3635 = vsyncadd [#allocation6], 4294942144 }
  0x57   :  { %3636 = dma.done.wait [#allocation9], 10240  }
  0x58   :  { %3637 = vsyncadd [#allocation9], 4294957056 }
  0x59   :  { %3638 = dma.done.wait [#allocation12], 2048  }
  0x5a   :  { %3639 = vsyncadd [#allocation12], 4294965248  ;;  %v3042_v0 = vld [vmem:[#allocation5 + $0xe4] ss:$16 sps:$4 sm:$0xff]   ;;  %v3046_v2 = vld [vmem:[#allocation5 + $0xe0] ss:$16 sps:$4 sm:$0xff]  }
  0x5b   :  { %v3044_v1 = vld [vmem:[#allocation5 + $0x2e4] ss:$16 sps:$4 sm:$0xff]   ;;  %1356 = vmatprep.subr.bf16.mxu0 %v3042_v0  ;;  %v3047_v3 = vld [vmem:[#allocation5 + $0x2e0] ss:$16 sps:$4 sm:$0xff]   ;;  %v134_v46 = vld [vmem:[#allocation2 + $0x8] sm:$0xff]  ;;  %vm1352_vm0 = vcmask 130048  }
  0x5c   :  { %1399 = vmatprep.subr.bf16.mxu1 %v3044_v1  ;;  %v3048_v4 = vld [vmem:[#allocation5 + $0xc4] ss:$16 sps:$4 sm:$0xff]   ;;  %1357 = vmatpush1.bf16.msra.mxu0 %v3046_v2  ;;  %v3052_v6 = vld [vmem:[#allocation5 + $0xc0] ss:$16 sps:$4 sm:$0xff]   ;;  %v136_v48 = vld [vmem:[#allocation2 + $0x18] sm:$0xff]  ;;  %vm3659_vm1 = vmmov 0  }
  0x5d   :  { %1400 = vmatpush1.bf16.msra.mxu1 %v3047_v3  ;;  %v3050_v5 = vld [vmem:[#allocation5 + $0x2c4] ss:$16 sps:$4 sm:$0xff]   ;;  %1358 = vmatprep.subr.bf16.mxu0 %v3048_v4  ;;  %v3053_v7 = vld [vmem:[#allocation5 + $0x2c0] ss:$16 sps:$4 sm:$0xff]  }
  0x5e   :  { %1401 = vmatprep.subr.bf16.mxu1 %v3050_v5  ;;  %v3054_v8 = vld [vmem:[#allocation5 + $0xa4] ss:$16 sps:$4 sm:$0xff]   ;;  %v3058_v10 = vld [vmem:[#allocation5 + $0xa0] ss:$16 sps:$4 sm:$0xff]  }
  0x5f   :  { %v3056_v9 = vld [vmem:[#allocation5 + $0x2a4] ss:$16 sps:$4 sm:$0xff]   ;;  %v3059_v11 = vld [vmem:[#allocation5 + $0x2a0] ss:$16 sps:$4 sm:$0xff]  }
  0x60   :  { %1359 = vmatpush1.bf16.msra.mxu0 %v3052_v6  ;;  %v3060_v12 = vld [vmem:[#allocation5 + $0x84] ss:$16 sps:$4 sm:$0xff]   ;;  %v3064_v14 = vld [vmem:[#allocation5 + $0x80] ss:$16 sps:$4 sm:$0xff]  }
  0x61   :  { %1402 = vmatpush1.bf16.msra.mxu1 %v3053_v7  ;;  %1360 = vmatprep.subr.bf16.mxu0 %v3054_v8  ;;  %v3062_v13 = vld [vmem:[#allocation5 + $0x284] ss:$16 sps:$4 sm:$0xff]   ;;  %v3065_v15 = vld [vmem:[#allocation5 + $0x280] ss:$16 sps:$4 sm:$0xff]   ;;  %v140_v7 = vld [vmem:[#allocation2 + $0x38] sm:$0xff] }
  0x62   :  { %1403 = vmatprep.subr.bf16.mxu1 %v3056_v9  ;;  %v3066_v16 = vld [vmem:[#allocation5 + $0x64] ss:$16 sps:$4 sm:$0xff]   ;;  %v3070_v18 = vld [vmem:[#allocation5 + $0x60] ss:$16 sps:$4 sm:$0xff]   ;;  %v142_v9 = vld [vmem:[#allocation2 + $0x48] sm:$0xff] }
  0x63   :  { %v3068_v17 = vld [vmem:[#allocation5 + $0x264] ss:$16 sps:$4 sm:$0xff]   ;;  %v3071_v19 = vld [vmem:[#allocation5 + $0x260] ss:$16 sps:$4 sm:$0xff]  }
  0x64   :  { %1361 = vmatpush1.bf16.msra.mxu0 %v3058_v10  ;;  %v3072_v20 = vld [vmem:[#allocation5 + $0x44] ss:$16 sps:$4 sm:$0xff]   ;;  %v3076_v22 = vld [vmem:[#allocation5 + $0x40] ss:$16 sps:$4 sm:$0xff]  }
  0x65   :  { %1404 = vmatpush1.bf16.msra.mxu1 %v3059_v11  ;;  %1362 = vmatprep.subr.bf16.mxu0 %v3060_v12  ;;  %v3074_v21 = vld [vmem:[#allocation5 + $0x244] ss:$16 sps:$4 sm:$0xff]   ;;  %v3077_v23 = vld [vmem:[#allocation5 + $0x240] ss:$16 sps:$4 sm:$0xff]  }
  0x66   :  { %1405 = vmatprep.subr.bf16.mxu1 %v3062_v13  ;;  %v3078_v24 = vld [vmem:[#allocation5 + $0x24] ss:$16 sps:$4 sm:$0xff]   ;;  %v3082_v26 = vld [vmem:[#allocation5 + $0x20] ss:$16 sps:$4 sm:$0xff]  }
  0x67   :  { %v3080_v25 = vld [vmem:[#allocation5 + $0x224] ss:$16 sps:$4 sm:$0xff]   ;;  %v3083_v27 = vld [vmem:[#allocation5 + $0x220] ss:$16 sps:$4 sm:$0xff]  }
  0x68   :  { %1363 = vmatpush1.bf16.msra.mxu0 %v3064_v14  ;;  %v3084_v28 = vld [vmem:[#allocation5 + $0x4] ss:$16 sps:$4 sm:$0xff]   ;;  %v3088_v30 = vld [vmem:[#allocation5] ss:$16 sps:$4 sm:$0xff]  }
  0x69   :  { %1406 = vmatpush1.bf16.msra.mxu1 %v3065_v15  ;;  %1364 = vmatprep.subr.bf16.mxu0 %v3066_v16  ;;  %v3086_v29 = vld [vmem:[#allocation5 + $0x204] ss:$16 sps:$4 sm:$0xff]   ;;  %v3089_v31 = vld [vmem:[#allocation5 + $0x200] ss:$16 sps:$4 sm:$0xff]  }
  0x6a   :  { %1407 = vmatprep.subr.bf16.mxu1 %v3068_v17  ;;  %v3090_v32 = vld [vmem:[#allocation5 + $0x1e4] ss:$16 sps:$4 sm:$0xff]   ;;  %v3094_v34 = vld [vmem:[#allocation5 + $0x1e0] ss:$16 sps:$4 sm:$0xff]   ;;  %v3149_v17 = vld [vmem:[#allocation5 + $0xec] ss:$16 sps:$4 sm:$0xff]  }
  0x6b   :  { %v3092_v33 = vld [vmem:[#allocation5 + $0x3e4] ss:$16 sps:$4 sm:$0xff]   ;;  %v3095_v35 = vld [vmem:[#allocation5 + $0x3e0] ss:$16 sps:$4 sm:$0xff]  }
  0x6c   :  { %1365 = vmatpush1.bf16.msra.mxu0 %v3070_v18  ;;  %v3096_v36 = vld [vmem:[#allocation5 + $0x1c4] ss:$16 sps:$4 sm:$0xff]   ;;  %v3100_v38 = vld [vmem:[#allocation5 + $0x1c0] ss:$16 sps:$4 sm:$0xff]  }
  0x6d   :  { %1408 = vmatpush1.bf16.msra.mxu1 %v3071_v19  ;;  %1366 = vmatprep.subr.bf16.mxu0 %v3072_v20  ;;  %v3098_v37 = vld [vmem:[#allocation5 + $0x3c4] ss:$16 sps:$4 sm:$0xff]   ;;  %v3101_v39 = vld [vmem:[#allocation5 + $0x3c0] ss:$16 sps:$4 sm:$0xff]   ;;  %v146_v20 = vld [vmem:[#allocation2 + $0x68] sm:$0xff] }
  0x6e   :  { %1409 = vmatprep.subr.bf16.mxu1 %v3074_v21  ;;  %v3102_v40 = vld [vmem:[#allocation5 + $0x1a4] ss:$16 sps:$4 sm:$0xff]   ;;  %v3106_v42 = vld [vmem:[#allocation5 + $0x1a0] ss:$16 sps:$4 sm:$0xff]   ;;  %v3657_v21 = vmov 0  }
  0x6f   :  { %v3104_v41 = vld [vmem:[#allocation5 + $0x3a4] ss:$16 sps:$4 sm:$0xff]   ;;  %v3107_v43 = vld [vmem:[#allocation5 + $0x3a0] ss:$16 sps:$4 sm:$0xff]  }
  0x70   :  { %1367 = vmatpush1.bf16.msra.mxu0 %v3076_v22  ;;  %v3108_v44 = vld [vmem:[#allocation5 + $0x184] ss:$16 sps:$4 sm:$0xff]   ;;  %v3112_v50 = vld [vmem:[#allocation5 + $0x180] ss:$16 sps:$4 sm:$0xff]  }
  0x71   :  { %1410 = vmatpush1.bf16.msra.mxu1 %v3077_v23  ;;  %1368 = vmatprep.subr.bf16.mxu0 %v3078_v24  ;;  %v3110_v45 = vld [vmem:[#allocation5 + $0x384] ss:$16 sps:$4 sm:$0xff]   ;;  %v3113_v51 = vld [vmem:[#allocation5 + $0x380] ss:$16 sps:$4 sm:$0xff]   ;;  %v3147_v24 = vld [vmem:[#allocation5 + $0xe8] ss:$16 sps:$4 sm:$0xff]  }
  0x72   :  { %1411 = vmatprep.subr.bf16.mxu1 %v3080_v25  ;;  %v141_v47 = vld [vmem:[#allocation2 + $0x40] sm:$0xff]  ;;  %v143_v49 = vld [vmem:[#allocation2 + $0x50] sm:$0xff] }
  0x73   :  { %v3114_v52 = vld [vmem:[#allocation5 + $0x164] ss:$16 sps:$4 sm:$0xff]   ;;  %v3754_v53 = vpack.c.bf16 %v141_v47, %v134_v46  ;;  %v3756_v54 = vpack.c.bf16 %v143_v49, %v136_v48  ;;  %v3118_v56 = vld [vmem:[#allocation5 + $0x160] ss:$16 sps:$4 sm:$0xff]   ;;  %v3177_v47 = vld [vmem:[#allocation5 + $0x48] ss:$16 sps:$4 sm:$0xff]  }
  0x74   :  { %1369 = vmatpush1.bf16.msra.mxu0 %v3082_v26  ;;  %v3116_v55 = vld [vmem:[#allocation5 + $0x364] ss:$16 sps:$4 sm:$0xff]   ;;  %v3119_v57 = vld [vmem:[#allocation5 + $0x360] ss:$16 sps:$4 sm:$0xff]   ;;  %v3155_v26 = vld [vmem:[#allocation5 + $0xcc] ss:$16 sps:$4 sm:$0xff]  }
  0x75   :  { %1412 = vmatpush1.bf16.msra.mxu1 %v3083_v27  ;;  %1370 = vmatprep.subr.bf16.mxu0 %v3084_v28  ;;  %v3120_v58 = vld [vmem:[#allocation5 + $0x144] ss:$16 sps:$4 sm:$0xff]   ;;  %v3124_v60 = vld [vmem:[#allocation5 + $0x140] ss:$16 sps:$4 sm:$0xff]   ;;  %v3153_v28 = vld [vmem:[#allocation5 + $0xc8] ss:$16 sps:$4 sm:$0xff]  }
  0x76   :  { %1413 = vmatprep.subr.bf16.mxu1 %v3086_v29  ;;  %1388 = vmatprep.mubr.bf16.mxu0 %v3754_v53  ;;  %v3122_v59 = vld [vmem:[#allocation5 + $0x344] ss:$16 sps:$4 sm:$0xff]   ;;  %v3125_v61 = vld [vmem:[#allocation5 + $0x340] ss:$16 sps:$4 sm:$0xff]   ;;  %v3185_v49 = vld [vmem:[#allocation5 + $0x2c] ss:$16 sps:$4 sm:$0xff]  }
  0x77   :  { %1431 = vmatprep.mubr.bf16.mxu1 %v3756_v54  ;;  %v3126_v62 = vld [vmem:[#allocation5 + $0x124] ss:$16 sps:$4 sm:$0xff]   ;;  %v3130_v0 = vld [vmem:[#allocation5 + $0x120] ss:$16 sps:$4 sm:$0xff]  }
  0x78   :  { %1371 = vmatpush1.bf16.msra.mxu0 %v3088_v30  ;;  %v3128_v63 = vld [vmem:[#allocation5 + $0x324] ss:$16 sps:$4 sm:$0xff]   ;;  %v3131_v1 = vld [vmem:[#allocation5 + $0x320] ss:$16 sps:$4 sm:$0xff]   ;;  %v3161_v30 = vld [vmem:[#allocation5 + $0xac] ss:$16 sps:$4 sm:$0xff]  }
  0x79   :  { %1414 = vmatpush1.bf16.msra.mxu1 %v3089_v31  ;;  %1372 = vmatprep.subr.bf16.mxu0 %v3090_v32  ;;  %v3132_v2 = vld [vmem:[#allocation5 + $0x104] ss:$16 sps:$4 sm:$0xff]   ;;  %v3136_v4 = vld [vmem:[#allocation5 + $0x100] ss:$16 sps:$4 sm:$0xff]   ;;  %v3159_v32 = vld [vmem:[#allocation5 + $0xa8] ss:$16 sps:$4 sm:$0xff]  }
  0x7a   :  { %1415 = vmatprep.subr.bf16.mxu1 %v3092_v33  ;;  %v3134_v3 = vld [vmem:[#allocation5 + $0x304] ss:$16 sps:$4 sm:$0xff]   ;;  %v3137_v5 = vld [vmem:[#allocation5 + $0x300] ss:$16 sps:$4 sm:$0xff]  }
  0x7b   :  { %v133_v6 = vld [vmem:[#allocation2] sm:$0xff]  ;;  %v135_v8 = vld [vmem:[#allocation2 + $0x10] sm:$0xff] }
  0x7c   :  { %1373 = vmatpush2.bf16.msra.mxu0 %v3094_v34  ;;  %v3140_v10 = vld [vmem:[#allocation5 + $0x4e4] ss:$16 sps:$4 sm:$0xff]   ;;  %v3760_v12 = vpack.c.bf16 %v140_v7, %v133_v6  ;;  %v3762_v13 = vpack.c.bf16 %v142_v9, %v135_v8  ;;  %v3138_v14 = vld [vmem:[#allocation5 + $0x4e0] ss:$16 sps:$4 sm:$0xff]   ;;  %v3167_v34 = vld [vmem:[#allocation5 + $0x8c] ss:$16 sps:$4 sm:$0xff]  }
  0x7d   :  { %1416 = vmatpush2.bf16.msra.mxu1 %v3095_v35  ;;  %1374 = vmatprep.subr.bf16.mxu0 %v3096_v36  ;;  %v3143_v11 = vld [vmem:[#allocation5 + $0x604] ss:$16 sps:$4 sm:$0xff]   ;;  %v3141_v15 = vld [vmem:[#allocation5 + $0x600] ss:$16 sps:$4 sm:$0xff]   ;;  %v3165_v36 = vld [vmem:[#allocation5 + $0x88] ss:$16 sps:$4 sm:$0xff]  }
  0x7e   :  { %1417 = vmatprep.subr.bf16.mxu1 %v3098_v37  ;;  %v3146_v16 = vld [vmem:[#allocation5 + $0x4c4] ss:$16 sps:$4 sm:$0xff]   ;;  %v3144_v18 = vld [vmem:[#allocation5 + $0x4c0] ss:$16 sps:$4 sm:$0xff]   ;;  %v3215_v6 = vld [vmem:[#allocation5 + $0x18c] ss:$16 sps:$4 sm:$0xff]  }
  0x7f   :  { %v139_v19 = vld [vmem:[#allocation2 + $0x30] sm:$0xff]  ;;  %v3213_v8 = vld [vmem:[#allocation5 + $0x188] ss:$16 sps:$4 sm:$0xff]  }
  0x80   :  { %1375 = vmatpush2.bf16.msra.mxu0 %v3100_v38  ;;  %v3152_v22 = vld [vmem:[#allocation5 + $0x4a4] ss:$16 sps:$4 sm:$0xff]   ;;  %v3767_v23 = vpack.c.bf16 %v146_v20, %v139_v19  ;;  %v3150_v25 = vld [vmem:[#allocation5 + $0x4a0] ss:$16 sps:$4 sm:$0xff]   ;;  %v3173_v38 = vld [vmem:[#allocation5 + $0x6c] ss:$16 sps:$4 sm:$0xff]  }
  0x81   :  { %1418 = vmatpush2.bf16.msra.mxu1 %v3101_v39  ;;  %1376 = vmatprep.subr.bf16.mxu0 %v3102_v40  ;;  %v3158_v27 = vld [vmem:[#allocation5 + $0x484] ss:$16 sps:$4 sm:$0xff]   ;;  %v3156_v29 = vld [vmem:[#allocation5 + $0x480] ss:$16 sps:$4 sm:$0xff]   ;;  %v3171_v40 = vld [vmem:[#allocation5 + $0x68] ss:$16 sps:$4 sm:$0xff]  }
  0x82   :  { %1419 = vmatprep.subr.bf16.mxu1 %v3104_v41  ;;  %v3164_v31 = vld [vmem:[#allocation5 + $0x464] ss:$16 sps:$4 sm:$0xff]   ;;  %v3162_v33 = vld [vmem:[#allocation5 + $0x460] ss:$16 sps:$4 sm:$0xff]   ;;  %v138_v41 = vld [vmem:[#allocation2 + $0x28] sm:$0xff] }
  0x83   :  { %v3170_v35 = vld [vmem:[#allocation5 + $0x444] ss:$16 sps:$4 sm:$0xff]   ;;  %v3168_v37 = vld [vmem:[#allocation5 + $0x440] ss:$16 sps:$4 sm:$0xff]  }
  0x84   :  { %1377 = vmatpush2.bf16.msra.mxu0 %v3106_v42  ;;  %v3176_v39 = vld [vmem:[#allocation5 + $0x424] ss:$16 sps:$4 sm:$0xff]   ;;  %v3180_v48 = vld [vmem:[#allocation5 + $0x400] ss:$16 sps:$4 sm:$0xff]  }
  0x85   :  { %1420 = vmatpush2.bf16.msra.mxu1 %v3107_v43  ;;  %1378 = vmatprep.subr.bf16.mxu0 %v3108_v44  ;;  %v145_v42 = vld [vmem:[#allocation2 + $0x60] sm:$0xff] }
  0x86   :  { %1421 = vmatprep.subr.bf16.mxu1 %v3110_v45  ;;  %v3174_v43 = vld [vmem:[#allocation5 + $0x420] ss:$16 sps:$4 sm:$0xff]   ;;  %v3772_v44 = vpack.c.bf16 %v145_v42, %v138_v41  ;;  %v3179_v45 = vld [vmem:[#allocation5 + $0x4c] ss:$16 sps:$4 sm:$0xff]   ;;  %v3182_v46 = vld [vmem:[#allocation5 + $0x404] ss:$16 sps:$4 sm:$0xff]  }
  0x87   :  { %v3218_v7 = vld [vmem:[#allocation5 + $0x544] ss:$16 sps:$4 sm:$0xff]   ;;  %v3216_v9 = vld [vmem:[#allocation5 + $0x540] ss:$16 sps:$4 sm:$0xff]   ;;  %v3257_v41 = vld [vmem:[#allocation5 + $0x4ac] ss:$16 sps:$4 sm:$0xff]  }
  0x88   :  { %1379 = vmatpush2.bf16.msra.mxu0 %v3112_v50  ;;  %v3188_v50 = vld [vmem:[#allocation5 + $0x5e4] ss:$16 sps:$4 sm:$0xff]   ;;  %v3228_v19 = vld [vmem:[#allocation5 + $0x500] ss:$16 sps:$4 sm:$0xff]   ;;  %v3260_v42 = vld [vmem:[#allocation5 + $0x26c] ss:$16 sps:$4 sm:$0xff]  }
  0x89   :  { %1422 = vmatpush2.bf16.msra.mxu1 %v3113_v51  ;;  %1380 = vmatprep.subr.bf16.mxu0 %v3114_v52  ;;  %v3183_v51 = vld [vmem:[#allocation5 + $0x28] ss:$16 sps:$4 sm:$0xff]   ;;  %v3186_v52 = vld [vmem:[#allocation5 + $0x5e0] ss:$16 sps:$4 sm:$0xff]  }
  0x8a   :  { %1423 = vmatprep.subr.bf16.mxu1 %v3116_v55  ;;  %v3194_v55 = vld [vmem:[#allocation5 + $0x5c4] ss:$16 sps:$4 sm:$0xff]  }
  0x8b   :  { %v137_v20 = vld [vmem:[#allocation2 + $0x20] sm:$0xff] }
  0x8c   :  { %1381 = vmatpush2.bf16.msra.mxu0 %v3118_v56  ;;  %v3189_v56 = vld [vmem:[#allocation5 + $0x8] ss:$16 sps:$4 sm:$0xff]  }
  0x8d   :  { %1424 = vmatpush2.bf16.msra.mxu1 %v3119_v57  ;;  %1382 = vmatprep.subr.bf16.mxu0 %v3120_v58  ;;  %v3192_v57 = vld [vmem:[#allocation5 + $0x5c0] ss:$16 sps:$4 sm:$0xff]   ;;  %v3197_v58 = vld [vmem:[#allocation5 + $0x1ec] ss:$16 sps:$4 sm:$0xff]  }
  0x8e   :  { %1425 = vmatprep.subr.bf16.mxu1 %v3122_v59  ;;  %v3200_v59 = vld [vmem:[#allocation5 + $0x5a4] ss:$16 sps:$4 sm:$0xff]  }
  0x90   :  { %1383 = vmatpush2.bf16.msra.mxu0 %v3124_v60  ;;  %v3195_v60 = vld [vmem:[#allocation5 + $0x1e8] ss:$16 sps:$4 sm:$0xff]  }
  0x91   :  { %1426 = vmatpush2.bf16.msra.mxu1 %v3125_v61  ;;  %1384 = vmatprep.subr.bf16.mxu0 %v3126_v62  ;;  %v3198_v61 = vld [vmem:[#allocation5 + $0x5a0] ss:$16 sps:$4 sm:$0xff]   ;;  %v3203_v62 = vld [vmem:[#allocation5 + $0x1cc] ss:$16 sps:$4 sm:$0xff]  }
  0x92   :  { %1427 = vmatprep.subr.bf16.mxu1 %v3128_v63  ;;  %v3206_v63 = vld [vmem:[#allocation5 + $0x584] ss:$16 sps:$4 sm:$0xff]  }
  0x94   :  { %1385 = vmatpush2.bf16.msra.mxu0 %v3130_v0  ;;  %v3201_v0 = vld [vmem:[#allocation5 + $0x1c8] ss:$16 sps:$4 sm:$0xff]  }
  0x95   :  { %1428 = vmatpush2.bf16.msra.mxu1 %v3131_v1  ;;  %1386 = vmatprep.subr.bf16.mxu0 %v3132_v2  ;;  %v3204_v1 = vld [vmem:[#allocation5 + $0x580] ss:$16 sps:$4 sm:$0xff]   ;;  %v3209_v2 = vld [vmem:[#allocation5 + $0x1ac] ss:$16 sps:$4 sm:$0xff]  }
  0x96   :  { %1429 = vmatprep.subr.bf16.mxu1 %v3134_v3  ;;  %v3212_v3 = vld [vmem:[#allocation5 + $0x564] ss:$16 sps:$4 sm:$0xff]  }
  0x98   :  { %1387 = vmatpush2.bf16.msra.mxu0 %v3136_v4  ;;  %v3207_v4 = vld [vmem:[#allocation5 + $0x1a8] ss:$16 sps:$4 sm:$0xff]  }
  0x99   :  { %1430 = vmatpush2.bf16.msra.mxu1 %v3137_v5  ;;  %1442 = vmatprep.subr.bf16.mxu0 %v3140_v10  ;;  %v3210_v5 = vld [vmem:[#allocation5 + $0x560] ss:$16 sps:$4 sm:$0xff]   ;;  %v3221_v10 = vld [vmem:[#allocation5 + $0x16c] ss:$16 sps:$4 sm:$0xff]  }
  0x9a   :  { %1499 = vmatprep.subr.bf16.mxu1 %v3143_v11  ;;  %v3224_v11 = vld [vmem:[#allocation5 + $0x524] ss:$16 sps:$4 sm:$0xff]  }
  0x9b   :  { %1389 = vmatmul.mubr.bf16.vlgmr.msra.gmra.mxu0 %v3760_v12 }
  0x9c   :  { %1432 = vmatmul.mubr.bf16.vlgmr.msra.gmra.mxu1 %v3762_v13  ;;  %1443 = vmatpush1.bf16.msra.mxu0 %v3138_v14  ;;  %v3219_v14 = vld [vmem:[#allocation5 + $0x168] ss:$16 sps:$4 sm:$0xff]  }
  0x9d   :  { %1500 = vmatpush1.bf16.msra.mxu1 %v3141_v15  ;;  %1444 = vmatprep.subr.bf16.mxu0 %v3146_v16  ;;  %v3222_v15 = vld [vmem:[#allocation5 + $0x520] ss:$16 sps:$4 sm:$0xff]   ;;  %v3227_v16 = vld [vmem:[#allocation5 + $0x14c] ss:$16 sps:$4 sm:$0xff]  }
  0x9e   :  { %1517 = vmatprep.mubr.bf16.mxu1 %v3657_v21  ;;  %1528 = vmatprep.subr.bf16.mxu1 %v3149_v17  ;;  %v3230_v17 = vld [vmem:[#allocation5 + $0x504] ss:$16 sps:$4 sm:$0xff]  }
  0x9f   :  { %1474 = vmatprep.mubr.bf16.mxu0 %v3772_v44 }
  0xa0   :  { %1445 = vmatpush1.bf16.msra.mxu0 %v3144_v18  ;;  %v3225_v18 = vld [vmem:[#allocation5 + $0x148] ss:$16 sps:$4 sm:$0xff]  }
  0xa1   :  { %1446 = vmatprep.subr.bf16.mxu0 %v3152_v22  ;;  %v144_v22 = vld [vmem:[#allocation2 + $0x58] sm:$0xff] }
  0xa4   :  { %2842 = vmatmul.mubr.msk.bf16.vlgmr.msra.gmra.mxu1 %vm1352_vm0, %v3767_v23  ;;  %1447 = vmatpush1.bf16.msra.mxu0 %v3150_v25  ;;  %v3236_v25 = vld [vmem:[#allocation5 + $0x2ec] ss:$16 sps:$4 sm:$0xff]  }
  0xa5   :  { %1529 = vmatpush1.bf16.msra.mxu1 %v3147_v24  ;;  %1448 = vmatprep.subr.bf16.mxu0 %v3158_v27  ;;  %v3233_v24 = vld [vmem:[#allocation5 + $0x12c] ss:$16 sps:$4 sm:$0xff]   ;;  %v3231_v27 = vld [vmem:[#allocation5 + $0x128] ss:$16 sps:$4 sm:$0xff]  }
  0xa6   :  { %1530 = vmatprep.subr.bf16.mxu1 %v3155_v26  ;;  %1560 = vmatprep.mubr.bf16.mxu1 %v3754_v53  ;;  %v3191_v53 = vld [vmem:[#allocation5 + $0xc] ss:$16 sps:$4 sm:$0xff]   ;;  %v3775_v26 = vpack.c.bf16 %v144_v22, %v137_v20  ;;  %v3315_v20 = vld [vmem:[#allocation5 + $0x568] ss:$16 sps:$4 sm:$0xff]  }
  0xa7   :  { %v3318_v22 = vld [vmem:[#allocation5 + $0x328] ss:$16 sps:$4 sm:$0xff]  }
  0xa8   :  { %1449 = vmatpush1.bf16.msra.mxu0 %v3156_v29  ;;  %v3239_v29 = vld [vmem:[#allocation5 + $0x10c] ss:$16 sps:$4 sm:$0xff]  }
  0xa9   :  { %1531 = vmatpush1.bf16.msra.mxu1 %v3153_v28  ;;  %1450 = vmatprep.subr.bf16.mxu0 %v3164_v31  ;;  %v3234_v28 = vld [vmem:[#allocation5 + $0x2e8] ss:$16 sps:$4 sm:$0xff]  }
  0xaa   :  { %1532 = vmatprep.subr.bf16.mxu1 %v3161_v30  ;;  %v3242_v30 = vld [vmem:[#allocation5 + $0x2cc] ss:$16 sps:$4 sm:$0xff]   ;;  %v3237_v31 = vld [vmem:[#allocation5 + $0x108] ss:$16 sps:$4 sm:$0xff]  }
  0xac   :  { %1451 = vmatpush1.bf16.msra.mxu0 %v3162_v33  ;;  %v3245_v33 = vld [vmem:[#allocation5 + $0x4ec] ss:$16 sps:$4 sm:$0xff]  }
  0xad   :  { %1533 = vmatpush1.bf16.msra.mxu1 %v3159_v32  ;;  %1452 = vmatprep.subr.bf16.mxu0 %v3170_v35  ;;  %v3240_v32 = vld [vmem:[#allocation5 + $0x2c8] ss:$16 sps:$4 sm:$0xff]  }
  0xae   :  { %1534 = vmatprep.subr.bf16.mxu1 %v3167_v34  ;;  %v3248_v34 = vld [vmem:[#allocation5 + $0x2ac] ss:$16 sps:$4 sm:$0xff]   ;;  %v3243_v35 = vld [vmem:[#allocation5 + $0x4e8] ss:$16 sps:$4 sm:$0xff]  }
  0xb0   :  { %1453 = vmatpush1.bf16.msra.mxu0 %v3168_v37  ;;  %v3251_v37 = vld [vmem:[#allocation5 + $0x4cc] ss:$16 sps:$4 sm:$0xff]  }
  0xb1   :  { %1535 = vmatpush1.bf16.msra.mxu1 %v3165_v36  ;;  %1454 = vmatprep.subr.bf16.mxu0 %v3176_v39  ;;  %v3246_v36 = vld [vmem:[#allocation5 + $0x2a8] ss:$16 sps:$4 sm:$0xff]  }
  0xb2   :  { %1536 = vmatprep.subr.bf16.mxu1 %v3173_v38  ;;  %v3254_v38 = vld [vmem:[#allocation5 + $0x28c] ss:$16 sps:$4 sm:$0xff]   ;;  %v3249_v39 = vld [vmem:[#allocation5 + $0x4c8] ss:$16 sps:$4 sm:$0xff]  }
  0xb4   :  { %1455 = vmatpush1.bf16.msra.mxu0 %v3174_v43  ;;  %v3255_v43 = vld [vmem:[#allocation5 + $0x4a8] ss:$16 sps:$4 sm:$0xff]  }
  0xb5   :  { %1537 = vmatpush1.bf16.msra.mxu1 %v3171_v40  ;;  %1456 = vmatprep.subr.bf16.mxu0 %v3182_v46  ;;  %v3252_v40 = vld [vmem:[#allocation5 + $0x288] ss:$16 sps:$4 sm:$0xff]   ;;  %v3266_v46 = vld [vmem:[#allocation5 + $0x24c] ss:$16 sps:$4 sm:$0xff]  }
  0xb6   :  { %1538 = vmatprep.subr.bf16.mxu1 %v3179_v45  ;;  %v3258_v45 = vld [vmem:[#allocation5 + $0x268] ss:$16 sps:$4 sm:$0xff]  }
  0xb8   :  { %1457 = vmatpush1.bf16.msra.mxu0 %v3180_v48  ;;  %v3269_v48 = vld [vmem:[#allocation5 + $0x46c] ss:$16 sps:$4 sm:$0xff]  }
  0xb9   :  { %1539 = vmatpush1.bf16.msra.mxu1 %v3177_v47  ;;  %1458 = vmatprep.subr.bf16.mxu0 %v3188_v50  ;;  %v3261_v47 = vld [vmem:[#allocation5 + $0x488] ss:$16 sps:$4 sm:$0xff]  }
  0xba   :  { %1540 = vmatprep.subr.bf16.mxu1 %v3185_v49  ;;  %v3272_v49 = vld [vmem:[#allocation5 + $0x22c] ss:$16 sps:$4 sm:$0xff]   ;;  %v3267_v50 = vld [vmem:[#allocation5 + $0x468] ss:$16 sps:$4 sm:$0xff]  }
  0xbc   :  { %1459 = vmatpush2.bf16.msra.mxu0 %v3186_v52  ;;  %v3275_v52 = vld [vmem:[#allocation5 + $0x44c] ss:$16 sps:$4 sm:$0xff]  }
  0xbd   :  { %1541 = vmatpush1.bf16.msra.mxu1 %v3183_v51  ;;  %1460 = vmatprep.subr.bf16.mxu0 %v3194_v55  ;;  %v3270_v51 = vld [vmem:[#allocation5 + $0x228] ss:$16 sps:$4 sm:$0xff]  }
  0xbe   :  { %1542 = vmatprep.subr.bf16.mxu1 %v3191_v53  ;;  %v3273_v53 = vld [vmem:[#allocation5 + $0x448] ss:$16 sps:$4 sm:$0xff]  }
  0xbf   :  { %v3276_v55 = vld [vmem:[#allocation5 + $0x208] ss:$16 sps:$4 sm:$0xff]  }
  0xc0   :  { %1461 = vmatpush2.bf16.msra.mxu0 %v3192_v57  ;;  %v3284_v57 = vld [vmem:[#allocation5 + $0x3ec] ss:$16 sps:$4 sm:$0xff]  }
  0xc1   :  { %1543 = vmatpush1.bf16.msra.mxu1 %v3189_v56  ;;  %1462 = vmatprep.subr.bf16.mxu0 %v3200_v59  ;;  %v3281_v56 = vld [vmem:[#allocation5 + $0x42c] ss:$16 sps:$4 sm:$0xff]   ;;  %v3282_v59 = vld [vmem:[#allocation5 + $0x3e8] ss:$16 sps:$4 sm:$0xff]  }
  0xc2   :  { %1544 = vmatprep.subr.bf16.mxu1 %v3197_v58  ;;  %v3279_v58 = vld [vmem:[#allocation5 + $0x428] ss:$16 sps:$4 sm:$0xff]  }
  0xc4   :  { %1463 = vmatpush2.bf16.msra.mxu0 %v3198_v61  ;;  %v3290_v61 = vld [vmem:[#allocation5 + $0x3cc] ss:$16 sps:$4 sm:$0xff]  }
  0xc5   :  { %1545 = vmatpush2.bf16.msra.mxu1 %v3195_v60  ;;  %1464 = vmatprep.subr.bf16.mxu0 %v3206_v63  ;;  %v3287_v60 = vld [vmem:[#allocation5 + $0x40c] ss:$16 sps:$4 sm:$0xff]   ;;  %v3288_v63 = vld [vmem:[#allocation5 + $0x3c8] ss:$16 sps:$4 sm:$0xff]  }
  0xc6   :  { %1546 = vmatprep.subr.bf16.mxu1 %v3203_v62  ;;  %v3285_v62 = vld [vmem:[#allocation5 + $0x408] ss:$16 sps:$4 sm:$0xff]  }
  0xc8   :  { %1465 = vmatpush2.bf16.msra.mxu0 %v3204_v1  ;;  %v3296_v1 = vld [vmem:[#allocation5 + $0x3ac] ss:$16 sps:$4 sm:$0xff]  }
  0xc9   :  { %1547 = vmatpush2.bf16.msra.mxu1 %v3201_v0  ;;  %1466 = vmatprep.subr.bf16.mxu0 %v3212_v3  ;;  %v3293_v0 = vld [vmem:[#allocation5 + $0x5ec] ss:$16 sps:$4 sm:$0xff]   ;;  %v3294_v3 = vld [vmem:[#allocation5 + $0x3a8] ss:$16 sps:$4 sm:$0xff]  }
  0xca   :  { %1548 = vmatprep.subr.bf16.mxu1 %v3209_v2  ;;  %v3291_v2 = vld [vmem:[#allocation5 + $0x5e8] ss:$16 sps:$4 sm:$0xff]  }
  0xcc   :  { %1467 = vmatpush2.bf16.msra.mxu0 %v3210_v5  ;;  %v3302_v5 = vld [vmem:[#allocation5 + $0x38c] ss:$16 sps:$4 sm:$0xff]  }
  0xcd   :  { %1549 = vmatpush2.bf16.msra.mxu1 %v3207_v4  ;;  %1468 = vmatprep.subr.bf16.mxu0 %v3218_v7  ;;  %v3299_v4 = vld [vmem:[#allocation5 + $0x5cc] ss:$16 sps:$4 sm:$0xff]   ;;  %v3300_v7 = vld [vmem:[#allocation5 + $0x388] ss:$16 sps:$4 sm:$0xff]  }
  0xce   :  { %1550 = vmatprep.subr.bf16.mxu1 %v3215_v6  ;;  %v3297_v6 = vld [vmem:[#allocation5 + $0x5c8] ss:$16 sps:$4 sm:$0xff]  }
  0xd0   :  { %1469 = vmatpush2.bf16.msra.mxu0 %v3216_v9  ;;  %v3308_v9 = vld [vmem:[#allocation5 + $0x36c] ss:$16 sps:$4 sm:$0xff]  }
  0xd1   :  { %1551 = vmatpush2.bf16.msra.mxu1 %v3213_v8  ;;  %1470 = vmatprep.subr.bf16.mxu0 %v3224_v11  ;;  %v3305_v8 = vld [vmem:[#allocation5 + $0x5ac] ss:$16 sps:$4 sm:$0xff]   ;;  %v3306_v11 = vld [vmem:[#allocation5 + $0x368] ss:$16 sps:$4 sm:$0xff]  }
  0xd2   :  { %1552 = vmatprep.subr.bf16.mxu1 %v3221_v10  ;;  %v3303_v10 = vld [vmem:[#allocation5 + $0x5a8] ss:$16 sps:$4 sm:$0xff]  }
  0xd4   :  { %1471 = vmatpush2.bf16.msra.mxu0 %v3222_v15  ;;  %v3314_v15 = vld [vmem:[#allocation5 + $0x34c] ss:$16 sps:$4 sm:$0xff]  }
  0xd5   :  { %1553 = vmatpush2.bf16.msra.mxu1 %v3219_v14  ;;  %1472 = vmatprep.subr.bf16.mxu0 %v3230_v17  ;;  %v3311_v14 = vld [vmem:[#allocation5 + $0x58c] ss:$16 sps:$4 sm:$0xff]   ;;  %v3312_v17 = vld [vmem:[#allocation5 + $0x348] ss:$16 sps:$4 sm:$0xff]  }
  0xd6   :  { %1554 = vmatprep.subr.bf16.mxu1 %v3227_v16  ;;  %v3309_v16 = vld [vmem:[#allocation5 + $0x588] ss:$16 sps:$4 sm:$0xff]  }
  0xd8   :  { %1473 = vmatpush2.bf16.msra.mxu0 %v3228_v19  ;;  %v3320_v19 = vld [vmem:[#allocation5 + $0x32c] ss:$16 sps:$4 sm:$0xff]  }
  0xd9   :  { %1555 = vmatpush2.bf16.msra.mxu1 %v3225_v18  ;;  %1571 = vmatprep.subr.bf16.mxu0 %v3236_v25  ;;  %v3317_v18 = vld [vmem:[#allocation5 + $0x56c] ss:$16 sps:$4 sm:$0xff]  }
  0xda   :  { %1556 = vmatprep.subr.bf16.mxu1 %v3233_v24  ;;  %v3323_v24 = vld [vmem:[#allocation5 + $0x54c] ss:$16 sps:$4 sm:$0xff]  }
  0xdb   :  { %1475 = vmatmul.mubr.bf16.vlgmr.msra.gmra.mxu0 %v3775_v26  ;;  %v3326_v25 = vld [vmem:[#allocation5 + $0x30c] ss:$16 sps:$4 sm:$0xff]  }
  0xdc   :  { %1572 = vmatpush1.bf16.msra.mxu0 %v3234_v28  ;;  %1603 = vmatprep.mubr.bf16.mxu0 %v3756_v54  ;;  %v3263_v54 = vld [vmem:[#allocation5 + $0x48c] ss:$16 sps:$4 sm:$0xff]   ;;  %v3324_v28 = vld [vmem:[#allocation5 + $0x308] ss:$16 sps:$4 sm:$0xff]  }
  0xdd   :  { %1557 = vmatpush2.bf16.msra.mxu1 %v3231_v27  ;;  %1573 = vmatprep.subr.bf16.mxu0 %v3242_v30  ;;  %v3321_v27 = vld [vmem:[#allocation5 + $0x548] ss:$16 sps:$4 sm:$0xff]  }
  0xde   :  { %1558 = vmatprep.subr.bf16.mxu1 %v3239_v29  ;;  %v3329_v29 = vld [vmem:[#allocation5 + $0x52c] ss:$16 sps:$4 sm:$0xff]   ;;  %v3338_v30 = vld [vmem:[#allocation8 + $0x74] ss:$8 sps:$4 sm:$0xff]  }
  0xe0   :  { %1574 = vmatpush1.bf16.msra.mxu0 %v3240_v32  ;;  %v3336_v32 = vld [vmem:[#allocation8 + $0x70] ss:$8 sps:$4 sm:$0xff]  }
  0xe1   :  { %1559 = vmatpush2.bf16.msra.mxu1 %v3237_v31  ;;  %1575 = vmatprep.subr.bf16.mxu0 %v3248_v34  ;;  %v3327_v31 = vld [vmem:[#allocation5 + $0x528] ss:$16 sps:$4 sm:$0xff]  }
  0xe2   :  { %1614 = vmatprep.subr.bf16.mxu1 %v3245_v33  ;;  %v3332_v33 = vld [vmem:[#allocation5 + $0x50c] ss:$16 sps:$4 sm:$0xff]   ;;  %v3341_v34 = vld [vmem:[#allocation8 + $0x64] ss:$8 sps:$4 sm:$0xff]  }
  0xe4   :  { %1561 = vmatmul.mubr.bf16.vlgmr.msra.gmra.mxu1 %v3760_v12  ;;  %1576 = vmatpush1.bf16.msra.mxu0 %v3246_v36  ;;  %v3264_v12 = vld [vmem:[#allocation5 + $0x248] ss:$16 sps:$4 sm:$0xff]   ;;  %v3339_v36 = vld [vmem:[#allocation8 + $0x60] ss:$8 sps:$4 sm:$0xff]  }
  0xe5   :  { %1615 = vmatpush1.bf16.msra.mxu1 %v3243_v35  ;;  %1577 = vmatprep.subr.bf16.mxu0 %v3254_v38  ;;  %v3330_v35 = vld [vmem:[#allocation5 + $0x508] ss:$16 sps:$4 sm:$0xff]  }
  0xe6   :  { %1616 = vmatprep.subr.bf16.mxu1 %v3251_v37  ;;  %1646 = vmatprep.mubr.bf16.mxu1 %v3772_v44  ;;  %v3278_v44 = vld [vmem:[#allocation5 + $0x20c] ss:$16 sps:$4 sm:$0xff]   ;;  %v3344_v38 = vld [vmem:[#allocation8 + $0x54] ss:$8 sps:$4 sm:$0xff]  }
  0xe7   :  { %v3335_v37 = vld [vmem:[#allocation5 + $0x60c] ss:$16 sps:$4 sm:$0xff]  }
  0xe8   :  { %1578 = vmatpush1.bf16.msra.mxu0 %v3252_v40  ;;  %v3342_v40 = vld [vmem:[#allocation8 + $0x50] ss:$8 sps:$4 sm:$0xff]  }
  0xe9   :  { %1617 = vmatpush1.bf16.msra.mxu1 %v3249_v39  ;;  %1579 = vmatprep.subr.bf16.mxu0 %v3260_v42  ;;  %v3333_v39 = vld [vmem:[#allocation5 + $0x608] ss:$16 sps:$4 sm:$0xff]  }
  0xea   :  { %1618 = vmatprep.subr.bf16.mxu1 %v3257_v41  ;;  %v3347_v41 = vld [vmem:[#allocation8 + $0x44] ss:$8 sps:$4 sm:$0xff]   ;;  %v3350_v42 = vld [vmem:[#allocation8 + $0x34] ss:$8 sps:$4 sm:$0xff]  }
  0xec   :  { %1580 = vmatpush1.bf16.msra.mxu0 %v3258_v45  ;;  %v3353_v45 = vld [vmem:[#allocation8 + $0x24] ss:$8 sps:$4 sm:$0xff]  }
  0xed   :  { %1619 = vmatpush1.bf16.msra.mxu1 %v3255_v43  ;;  %1581 = vmatprep.subr.bf16.mxu0 %v3266_v46  ;;  %v3348_v43 = vld [vmem:[#allocation8 + $0x30] ss:$8 sps:$4 sm:$0xff]   ;;  %v3386_v46 = vld [vmem:[#allocation8 + $0x174] ss:$8 sps:$4 sm:$0xff]  }
  0xee   :  { %1620 = vmatprep.subr.bf16.mxu1 %v3263_v54  ;;  %v3384_v54 = vld [vmem:[#allocation8 + $0x170] ss:$8 sps:$4 sm:$0xff]  }
  0xf0   :  { %1582 = vmatpush1.bf16.msra.mxu0 %v3264_v12  ;;  %v3351_v12 = vld [vmem:[#allocation8 + $0x20] ss:$8 sps:$4 sm:$0xff]  }
  0xf1   :  { %1621 = vmatpush1.bf16.msra.mxu1 %v3261_v47  ;;  %1583 = vmatprep.subr.bf16.mxu0 %v3272_v49  ;;  %v3389_v47 = vld [vmem:[#allocation8 + $0x164] ss:$8 sps:$4 sm:$0xff]   ;;  %v3354_v49 = vld [vmem:[#allocation8 + $0x10] ss:$8 sps:$4 sm:$0xff]  }
  0xf2   :  { %1622 = vmatprep.subr.bf16.mxu1 %v3269_v48  ;;  %v3392_v48 = vld [vmem:[#allocation8 + $0x154] ss:$8 sps:$4 sm:$0xff]  }
  0xf4   :  { %1584 = vmatpush1.bf16.msra.mxu0 %v3270_v51  ;;  %v3390_v51 = vld [vmem:[#allocation8 + $0x150] ss:$8 sps:$4 sm:$0xff]  }
  0xf5   :  { %1623 = vmatpush1.bf16.msra.mxu1 %v3267_v50  ;;  %1585 = vmatprep.subr.bf16.mxu0 %v3278_v44  ;;  %v3359_v50 = vld [vmem:[#allocation8 + $0x4] ss:$8 sps:$4 sm:$0xff]   ;;  %v3362_v44 = vld [vmem:[#allocation8 + $0xf4] ss:$8 sps:$4 sm:$0xff]  }
  0xf6   :  { %1624 = vmatprep.subr.bf16.mxu1 %v3275_v52  ;;  %v3357_v52 = vld [vmem:[#allocation8] ss:$8 sps:$4 sm:$0xff]  }
  0xf8   :  { %1586 = vmatpush1.bf16.msra.mxu0 %v3276_v55  ;;  %v3398_v55 = vld [vmem:[#allocation8 + $0x134] ss:$8 sps:$4 sm:$0xff]  }
  0xf9   :  { %1625 = vmatpush1.bf16.msra.mxu1 %v3273_v53  ;;  %1587 = vmatprep.subr.bf16.mxu0 %v3284_v57  ;;  %v3393_v53 = vld [vmem:[#allocation8 + $0x140] ss:$8 sps:$4 sm:$0xff]   ;;  %v3365_v57 = vld [vmem:[#allocation8 + $0xe4] ss:$8 sps:$4 sm:$0xff]  }
  0xfa   :  { %1626 = vmatprep.subr.bf16.mxu1 %v3281_v56  ;;  %v3360_v56 = vld [vmem:[#allocation8 + $0xf0] ss:$8 sps:$4 sm:$0xff]  }
  0xfc   :  { %1588 = vmatpush2.bf16.msra.mxu0 %v3282_v59  ;;  %v3401_v59 = vld [vmem:[#allocation8 + $0x124] ss:$8 sps:$4 sm:$0xff]  }
  0xfd   :  { %1627 = vmatpush1.bf16.msra.mxu1 %v3279_v58  ;;  %1589 = vmatprep.subr.bf16.mxu0 %v3290_v61  ;;  %v3396_v58 = vld [vmem:[#allocation8 + $0x130] ss:$8 sps:$4 sm:$0xff]   ;;  %v3368_v61 = vld [vmem:[#allocation8 + $0xd4] ss:$8 sps:$4 sm:$0xff]  }
  0xfe   :  { %1628 = vmatprep.subr.bf16.mxu1 %v3287_v60  ;;  %v3363_v60 = vld [vmem:[#allocation8 + $0xe0] ss:$8 sps:$4 sm:$0xff]  }
 0x100   :  { %1590 = vmatpush2.bf16.msra.mxu0 %v3288_v63  ;;  %v3404_v63 = vld [vmem:[#allocation8 + $0x114] ss:$8 sps:$4 sm:$0xff]  }
 0x101   :  { %1629 = vmatpush1.bf16.msra.mxu1 %v3285_v62  ;;  %1591 = vmatprep.subr.bf16.mxu0 %v3296_v1  ;;  %v3399_v62 = vld [vmem:[#allocation8 + $0x120] ss:$8 sps:$4 sm:$0xff]   ;;  %v3371_v1 = vld [vmem:[#allocation8 + $0xc4] ss:$8 sps:$4 sm:$0xff]  }
 0x102   :  { %1630 = vmatprep.subr.bf16.mxu1 %v3293_v0  ;;  %v3366_v0 = vld [vmem:[#allocation8 + $0xd0] ss:$8 sps:$4 sm:$0xff]  }
 0x104   :  { %1592 = vmatpush2.bf16.msra.mxu0 %v3294_v3  ;;  %v3407_v3 = vld [vmem:[#allocation8 + $0x104] ss:$8 sps:$4 sm:$0xff]  }
 0x105   :  { %1631 = vmatpush2.bf16.msra.mxu1 %v3291_v2  ;;  %1593 = vmatprep.subr.bf16.mxu0 %v3302_v5  ;;  %v3402_v2 = vld [vmem:[#allocation8 + $0x110] ss:$8 sps:$4 sm:$0xff]   ;;  %v3374_v5 = vld [vmem:[#allocation8 + $0xb4] ss:$8 sps:$4 sm:$0xff]  }
 0x106   :  { %1632 = vmatprep.subr.bf16.mxu1 %v3299_v4  ;;  %v3369_v4 = vld [vmem:[#allocation8 + $0xc0] ss:$8 sps:$4 sm:$0xff]  }
 0x108   :  { %1594 = vmatpush2.bf16.msra.mxu0 %v3300_v7  ;;  %v3410_v7 = vld [vmem:[#allocation8 + $0x1f4] ss:$8 sps:$4 sm:$0xff]  }
 0x109   :  { %1633 = vmatpush2.bf16.msra.mxu1 %v3297_v6  ;;  %1595 = vmatprep.subr.bf16.mxu0 %v3308_v9  ;;  %v3405_v6 = vld [vmem:[#allocation8 + $0x100] ss:$8 sps:$4 sm:$0xff]   ;;  %v3377_v9 = vld [vmem:[#allocation8 + $0xa4] ss:$8 sps:$4 sm:$0xff]  }
 0x10a   :  { %1634 = vmatprep.subr.bf16.mxu1 %v3305_v8  ;;  %v3372_v8 = vld [vmem:[#allocation8 + $0xb0] ss:$8 sps:$4 sm:$0xff]  }
 0x10c   :  { %1596 = vmatpush2.bf16.msra.mxu0 %v3306_v11  ;;  %v3375_v11 = vld [vmem:[#allocation8 + $0xa0] ss:$8 sps:$4 sm:$0xff]  }
 0x10d   :  { %1635 = vmatpush2.bf16.msra.mxu1 %v3303_v10  ;;  %1597 = vmatprep.subr.bf16.mxu0 %v3314_v15  ;;  %v3408_v10 = vld [vmem:[#allocation8 + $0x1f0] ss:$8 sps:$4 sm:$0xff]  }
 0x10e   :  { %1636 = vmatprep.subr.bf16.mxu1 %v3311_v14  ;;  %v3380_v14 = vld [vmem:[#allocation8 + $0x94] ss:$8 sps:$4 sm:$0xff]   ;;  %v3378_v15 = vld [vmem:[#allocation8 + $0x90] ss:$8 sps:$4 sm:$0xff]  }
 0x110   :  { %1598 = vmatpush2.bf16.msra.mxu0 %v3312_v17  ;;  %v3381_v17 = vld [vmem:[#allocation8 + $0x80] ss:$8 sps:$4 sm:$0xff]  }
 0x111   :  { %1637 = vmatpush2.bf16.msra.mxu1 %v3309_v16  ;;  %1599 = vmatprep.subr.bf16.mxu0 %v3320_v19  ;;  %v3383_v16 = vld [vmem:[#allocation8 + $0x84] ss:$8 sps:$4 sm:$0xff]   ;;  %v3411_v19 = vld [vmem:[#allocation8 + $0x1e0] ss:$8 sps:$4 sm:$0xff]  }
 0x112   :  { %1638 = vmatprep.subr.bf16.mxu1 %v3317_v18  ;;  %v3413_v18 = vld [vmem:[#allocation8 + $0x1e4] ss:$8 sps:$4 sm:$0xff]  }
 0x114   :  { %1600 = vmatpush2.bf16.msra.mxu0 %v3318_v22  ;;  %v3414_v22 = vld [vmem:[#allocation8 + $0x1d0] ss:$8 sps:$4 sm:$0xff]  }
 0x115   :  { %1639 = vmatpush2.bf16.msra.mxu1 %v3315_v20  ;;  %1601 = vmatprep.subr.bf16.mxu0 %v3326_v25  ;;  %v3416_v20 = vld [vmem:[#allocation8 + $0x1d4] ss:$8 sps:$4 sm:$0xff]   ;;  %v3417_v25 = vld [vmem:[#allocation8 + $0x1c0] ss:$8 sps:$4 sm:$0xff]  }
 0x116   :  { %1640 = vmatprep.subr.bf16.mxu1 %v3323_v24  ;;  %v3419_v24 = vld [vmem:[#allocation8 + $0x1c4] ss:$8 sps:$4 sm:$0xff]  }
 0x118   :  { %1602 = vmatpush2.bf16.msra.mxu0 %v3324_v28  ;;  %v3420_v28 = vld [vmem:[#allocation8 + $0x1b0] ss:$8 sps:$4 sm:$0xff]  }
 0x119   :  { %1641 = vmatpush2.bf16.msra.mxu1 %v3321_v27  ;;  %2108 = vmatprep.subr.bf16.mxu0 %v3338_v30  ;;  %v3422_v27 = vld [vmem:[#allocation8 + $0x1b4] ss:$8 sps:$4 sm:$0xff]   ;;  %v3423_v30 = vld [vmem:[#allocation8 + $0x1a0] ss:$8 sps:$4 sm:$0xff]  }
 0x11a   :  { %1642 = vmatprep.subr.bf16.mxu1 %v3329_v29  ;;  %v3425_v29 = vld [vmem:[#allocation8 + $0x1a4] ss:$8 sps:$4 sm:$0xff]  }
 0x11b   :  { %1604 = vmatmul.mubr.bf16.vlgmr.msra.gmra.mxu0 %v3762_v13  ;;  %v3345_v13 = vld [vmem:[#allocation8 + $0x40] ss:$8 sps:$4 sm:$0xff]  }
 0x11c   :  { %2109 = vmatpush1.bf16.msra.mxu0 %v3336_v32  ;;  %v3426_v32 = vld [vmem:[#allocation8 + $0x190] ss:$8 sps:$4 sm:$0xff]  }
 0x11d   :  { %1643 = vmatpush2.bf16.msra.mxu1 %v3327_v31  ;;  %2110 = vmatprep.subr.bf16.mxu0 %v3341_v34  ;;  %v3428_v31 = vld [vmem:[#allocation8 + $0x194] ss:$8 sps:$4 sm:$0xff]   ;;  %v3429_v34 = vld [vmem:[#allocation8 + $0x180] ss:$8 sps:$4 sm:$0xff]  }
 0x11e   :  { %1644 = vmatprep.subr.bf16.mxu1 %v3332_v33  ;;  %v3431_v33 = vld [vmem:[#allocation8 + $0x184] ss:$8 sps:$4 sm:$0xff]  }
 0x120   :  { %2111 = vmatpush1.bf16.msra.mxu0 %v3339_v36  ;;  %v352_v36 = vlaneseq }
 0x121   :  { %1645 = vmatpush2.bf16.msra.mxu1 %v3330_v35  ;;  %2112 = vmatprep.subr.bf16.mxu0 %v3344_v38 }
 0x122   :  { %1671 = vmatprep.subr.bf16.mxu1 %v3335_v37  ;;  %v3786_v38 = vshrl.u32 %v352_v36, 7 }
 0x124   :  { %1647 = vmatmul.mubr.bf16.vlgmr.msra.gmra.mxu1 %v3775_v26  ;;  %2113 = vmatpush1.bf16.msra.mxu0 %v3342_v40  ;;  %v3356_v26 = vld [vmem:[#allocation8 + $0x14] ss:$8 sps:$4 sm:$0xff]  }
 0x125   :  { %1672 = vmatpush1.bf16.msra.mxu1 %v3333_v39  ;;  %1689 = vmatprep.mubr.bf16.mxu1 %v3657_v21  ;;  %v3387_v21 = vld [vmem:[#allocation8 + $0x160] ss:$8 sps:$4 sm:$0xff]  }
 0x126   :  { %2114 = vmatprep.subr.bf16.mxu0 %v3347_v41  ;;  %2151 = vmatprep.subr.bf16.mxu1 %v3386_v46  ;;  %v358_v41 = vsub.s32 1, %v3786_v38 }
 0x128   :  { %2115 = vmatpush1.bf16.msra.mxu0 %v3345_v13  ;;  %v354_v13 = vsub.s32 0, %v3786_v38 }
 0x129   :  { %2116 = vmatprep.subr.bf16.mxu0 %v3350_v42 }
 0x12c   :  { %2843 = vmatmul.mubr.msk.bf16.vlgmr.msra.gmra.mxu1 %vm1352_vm0, %v3767_v23  ;;  %2117 = vmatpush1.bf16.msra.mxu0 %v3348_v43  ;;  %v3395_v23 = vld [vmem:[#allocation8 + $0x144] ss:$8 sps:$4 sm:$0xff]   ;;  %v350_v43 = vld [vmem:[#allocation7] sm:$0xf] }
 0x12d   :  { %2118 = vmatprep.subr.bf16.mxu0 %v3353_v45  ;;  %2152 = vmatpush1.bf16.msra.mxu1 %v3384_v54  ;;  %v359_v54 = vrot.slane %v350_v43, %v358_v41  ;;  %v355_v46 = vrot.slane %v350_v43, %v354_v13 }
 0x12e   :  { %2153 = vmatprep.subr.bf16.mxu1 %v3389_v47 }
 0x130   :  { %2119 = vmatpush1.bf16.msra.mxu0 %v3351_v12 }
 0x131   :  { %2120 = vmatprep.subr.bf16.mxu0 %v3356_v26  ;;  %2154 = vmatpush1.bf16.msra.mxu1 %v3387_v21 }
 0x132   :  { %2155 = vmatprep.subr.bf16.mxu1 %v3392_v48 }
 0x134   :  { %2121 = vmatpush1.bf16.msra.mxu0 %v3354_v49 }
 0x135   :  { %2122 = vmatprep.subr.bf16.mxu0 %v3359_v50  ;;  %2156 = vmatpush1.bf16.msra.mxu1 %v3390_v51 }
 0x136   :  { %2157 = vmatprep.subr.bf16.mxu1 %v3395_v23 }
 0x138   :  { %2123 = vmatpush1.bf16.msra.mxu0 %v3357_v52 }
 0x139   :  { %2124 = vmatprep.subr.bf16.mxu0 %v3362_v44  ;;  %2158 = vmatpush1.bf16.msra.mxu1 %v3393_v53 }
 0x13a   :  { %2159 = vmatprep.subr.bf16.mxu1 %v3398_v55 }
 0x13c   :  { %2125 = vmatpush2.bf16.msra.mxu0 %v3360_v56 }
 0x13d   :  { %2126 = vmatprep.subr.bf16.mxu0 %v3365_v57  ;;  %2160 = vmatpush1.bf16.msra.mxu1 %v3396_v58 }
 0x13e   :  { %2161 = vmatprep.subr.bf16.mxu1 %v3401_v59 }
 0x140   :  { %2127 = vmatpush2.bf16.msra.mxu0 %v3363_v60 }
 0x141   :  { %2128 = vmatprep.subr.bf16.mxu0 %v3368_v61  ;;  %2162 = vmatpush1.bf16.msra.mxu1 %v3399_v62 }
 0x142   :  { %2163 = vmatprep.subr.bf16.mxu1 %v3404_v63 }
 0x144   :  { %2129 = vmatpush2.bf16.msra.mxu0 %v3366_v0 }
 0x145   :  { %2130 = vmatprep.subr.bf16.mxu0 %v3371_v1  ;;  %2164 = vmatpush1.bf16.msra.mxu1 %v3402_v2 }
 0x146   :  { %2165 = vmatprep.subr.bf16.mxu1 %v3407_v3 }
 0x148   :  { %2131 = vmatpush2.bf16.msra.mxu0 %v3369_v4 }
 0x149   :  { %2132 = vmatprep.subr.bf16.mxu0 %v3374_v5  ;;  %2166 = vmatpush1.bf16.msra.mxu1 %v3405_v6 }
 0x14a   :  { %2167 = vmatprep.subr.bf16.mxu1 %v3410_v7 }
 0x14c   :  { %2133 = vmatpush2.bf16.msra.mxu0 %v3372_v8 }
 0x14d   :  { %2134 = vmatprep.subr.bf16.mxu0 %v3377_v9  ;;  %2168 = vmatpush2.bf16.msra.mxu1 %v3408_v10 }
 0x14e   :  { %2169 = vmatprep.subr.bf16.mxu1 %v3413_v18  ;;  %v366_v18 = vsub.s32 3, %v3786_v38 }
 0x150   :  { %2135 = vmatpush2.bf16.msra.mxu0 %v3375_v11 }
 0x151   :  { %2136 = vmatprep.subr.bf16.mxu0 %v3380_v14  ;;  %2170 = vmatpush2.bf16.msra.mxu1 %v3411_v19  ;;  %v362_v19 = vsub.s32 2, %v3786_v38 }
 0x152   :  { %2171 = vmatprep.subr.bf16.mxu1 %v3416_v20 }
 0x154   :  { %2137 = vmatpush2.bf16.msra.mxu0 %v3378_v15 }
 0x155   :  { %2138 = vmatprep.subr.bf16.mxu0 %v3383_v16  ;;  %2172 = vmatpush2.bf16.msra.mxu1 %v3414_v22 }
 0x156   :  { %2173 = vmatprep.subr.bf16.mxu1 %v3419_v24 }
 0x158   :  { %2139 = vmatpush2.bf16.msra.mxu0 %v3381_v17 }
 0x159   :  { %2174 = vmatpush2.bf16.msra.mxu1 %v3417_v25  ;;  %v367_v25 = vrot.slane %v350_v43, %v366_v18 }
 0x15a   :  { %2175 = vmatprep.subr.bf16.mxu1 %v3422_v27  ;;  %v363_v27 = vrot.slane %v350_v43, %v362_v19 }
 0x15b   :  { %v1390_v39 = vpop.f32.mrf.mxu0 }
 0x15c   :  { %v1433_v35 = vpop.f32.mrf.mxu1  ;;  %v1391_v21 = vadd.f32 %v1390_v39, %v355_v46 }
 0x15d   :  { %2176 = vmatpush2.bf16.msra.mxu1 %v3420_v28  ;;  %v1392_v42 = vpop.f32.mrf.mxu0 }
 0x15e   :  { %2177 = vmatprep.subr.bf16.mxu1 %v3425_v29  ;;  %v1435_v37 = vpop.f32.mrf.mxu1  ;;  %v1393_v26 = vadd.f32 %v1392_v42, %v359_v54  ;;  %v1434_v44 = vadd.f32 %v1433_v35, %v1391_v21 }
 0x15f   :  { %v1394_v47 = vpop.f32.mrf.mxu0 }
 0x160   :  { %v1437_v40 = vpop.f32.mrf.mxu1  ;;  %v1395_v49 = vadd.f32 %v1394_v47, %v355_v46  ;;  %v1436_v23 = vadd.f32 %v1435_v37, %v1393_v26 }
 0x161   :  { %2178 = vmatpush2.bf16.msra.mxu1 %v3423_v30  ;;  %v1396_v48 = vpop.f32.mrf.mxu0 }
 0x162   :  { %2179 = vmatprep.subr.bf16.mxu1 %v3428_v31  ;;  %v1439_v45 = vpop.f32.mrf.mxu1  ;;  %v1397_v52 = vadd.f32 %v1396_v48, %v359_v54  ;;  %v1438_v55 = vadd.f32 %v1437_v40, %v1395_v49 }
 0x164   :  { %v1519_v12 = vpop.f32.mrf.mxu1  ;;  %v1440_v60 = vadd.f32 %v1439_v45, %v1397_v52  ;;  %v3434_v52 = vld [vmem:[#allocation10 + $0x70] sm:$0xff]  }
 0x165   :  { %2180 = vmatpush2.bf16.msra.mxu1 %v3426_v32 }
 0x166   :  { %2181 = vmatprep.subr.bf16.mxu1 %v3431_v33  ;;  %v1521_v50 = vpop.f32.mrf.mxu1 }
 0x168   :  { %v1523_v57 = vpop.f32.mrf.mxu1 }
 0x169   :  { %2182 = vmatpush2.bf16.msra.mxu1 %v3429_v34 }
 0x16a   :  { %v1525_v2 = vpop.f32.mrf.mxu1 }
 0x19b   :  { %v1476_v51 = vpop.f32.mrf.mxu0 }
 0x19c   :  { %v1477_v58 = vadd.f32 %v1476_v51, %v1434_v44  ;;  %v3432_v51 = vld [vmem:[#allocation10 + $0x78] sm:$0xff]  }
 0x19d   :  { %v1478_v53 = vpop.f32.mrf.mxu0  ;;  %2943 = vmatprep.subr.bf16.mxu0 %v3432_v51  ;;  %v2908_v51 = vld [vmem:[%s3842_s6] ss:$0 sm:$0xff] }
 0x19e   :  { %v1479_v56 = vadd.f32 %v1478_v53, %v1436_v23  ;;  %v1520_v3 = vadd.f32 %v1519_v12, %v1477_v58  ;;  %v3433_v23 = vld [vmem:[#allocation10 + $0x38] sm:$0xff]  }
 0x19f   :  { %v1480_v59 = vpop.f32.mrf.mxu0 }
 0x1a0   :  { %v1481_v61 = vadd.f32 %v1480_v59, %v1438_v55  ;;  %v1522_v63 = vadd.f32 %v1521_v50, %v1479_v56  ;;  %v1700_v8 = vmax.f32 %v1520_v3, 0.0  ;;  %v3436_v59 = vld [vmem:[#allocation10 + $0x68] sm:$0xff]   ;;  %v3443_v3 = vld [vmem:[#allocation10 + $0x10] sm:$0xff]  }
 0x1a1   :  { %v1482_v62 = vpop.f32.mrf.mxu0 }
 0x1a2   :  { %v1524_v0 = vadd.f32 %v1523_v57, %v1481_v61  ;;  %v1483_v1 = vadd.f32 %v1482_v62, %v1440_v60  ;;  %v1701_v6 = vmax.f32 %v1522_v63, 0.0  ;;  %v3435_v57 = vld [vmem:[#allocation10 + $0x30] sm:$0xff]   ;;  %v3437_v61 = vld [vmem:[#allocation10 + $0x28] sm:$0xff]   ;;  %v3438_v62 = vld [vmem:[#allocation10 + $0x60] sm:$0xff]  }
 0x1a3   :  { %v3439_v63 = vld [vmem:[#allocation10 + $0x20] sm:$0xff]  }
 0x1a4   :  { %v1526_v4 = vadd.f32 %v1525_v2, %v1483_v1  ;;  %v1704_v5 = vmax.f32 %v1524_v0, 0.0  ;;  %v1562_v11 = vpop.f32.mrf.mxu1  ;;  %v3440_v0 = vld [vmem:[#allocation10 + $0x58] sm:$0xff]   ;;  %v3442_v2 = vld [vmem:[#allocation10 + $0x50] sm:$0xff]  }
 0x1a5   :  { %v1563_v33 = vadd.f32 %v1562_v11, %v363_v27  ;;  %v3441_v1 = vld [vmem:[#allocation10 + $0x18] sm:$0xff]   ;;  %v3450_v11 = vld [vmem:[#allocation11 + $0x28] sm:$0xff]  }
 0x1a6   :  { %v1705_v7 = vmax.f32 %v1526_v4, 0.0  ;;  %v1708_v10 = vpack.c.bf16 %v1704_v5, %v1700_v8  ;;  %v1564_v14 = vpop.f32.mrf.mxu1  ;;  %v3444_v4 = vld [vmem:[#allocation10 + $0x48] sm:$0xff]   ;;  %v3448_v8 = vld [vmem:[#allocation11 + $0x38] sm:$0xff]  }
 0x1a7   :  { %v1565_v31 = vadd.f32 %v1564_v14, %v367_v25  ;;  %v3445_v5 = vld [vmem:[#allocation10 + $0x8] sm:$0xff]   ;;  %v3451_v14 = vld [vmem:[#allocation11 + $0x20] sm:$0xff]  }
 0x1a8   :  { %v1709_v9 = vpack.c.bf16 %v1705_v7, %v1701_v6  ;;  %v1566_v15 = vpop.f32.mrf.mxu1  ;;  %v3446_v6 = vld [vmem:[#allocation10 + $0x40] sm:$0xff]  }
 0x1a9   :  { %v1567_v32 = vadd.f32 %v1566_v15, %v363_v27  ;;  %v3447_v7 = vld [vmem:[#allocation10] sm:$0xff]  }
 0x1aa   :  { %2140 = vmatprep.mubr.bf16.mxu0 %v1709_v9  ;;  %v1568_v17 = vpop.f32.mrf.mxu1  ;;  %v3658_v9 = vmov 0.0  }
 0x1ab   :  { %2141 = vmatmul.mubr.bf16.vlgmr.msra.gmra.mxu0 %v1708_v10  ;;  %v1569_v36 = vadd.f32 %v1568_v17, %v367_v25  ;;  %2983 = vmatprep.subr.bf16.mxu1 %v3658_v9  ;;  %v3449_v10 = vld [vmem:[#allocation11 + $0x30] sm:$0xff]   ;;  %v1776_v17 = vld [vmem:[%s3840_s4] sm:$0x3] }
 0x1ac   :  { %2944 = vmatpush3.bf16.msra.mxu0 %v3433_v23  ;;  %v1785_v19 = vrot.slane %v1776_v17, %v358_v41 }
 0x1ad   :  { %2945 = vmatprep.subr.bf16.mxu0 %v3434_v52 }
 0x1b0   :  { %2946 = vmatpush3.bf16.msra.mxu0 %v3435_v57 }
 0x1b1   :  { %2947 = vmatprep.subr.bf16.mxu0 %v3436_v59  ;;  %v3461_v59 = vld [vmem:[#allocation13 + $0x10] sm:$0xff]  }
 0x1b4   :  { %2948 = vmatpush3.bf16.msra.mxu0 %v3437_v61  ;;  %v3463_v61 = vld [vmem:[#allocation13] sm:$0xff]  }
 0x1b5   :  { %2949 = vmatprep.subr.bf16.mxu0 %v3438_v62  ;;  %v2925_v62 = vld [vmem:[%s3844_s8] ss:$0 sm:$0xff] }
 0x1b8   :  { %2950 = vmatpush3.bf16.msra.mxu0 %v3439_v63 }
 0x1b9   :  { %2951 = vmatprep.subr.bf16.mxu0 %v3440_v0 }
 0x1bc   :  { %2952 = vmatpush3.bf16.msra.mxu0 %v3441_v1 }
 0x1bd   :  { %2953 = vmatprep.subr.bf16.mxu0 %v3442_v2 }
 0x1c0   :  { %2954 = vmatpush3.bf16.msra.mxu0 %v3443_v3 }
 0x1c1   :  { %2955 = vmatprep.subr.bf16.mxu0 %v3444_v4 }
 0x1c4   :  { %2956 = vmatpush3.bf16.msra.mxu0 %v3445_v5 }
 0x1c5   :  { %2957 = vmatprep.subr.bf16.mxu0 %v3446_v6 }
 0x1c8   :  { %2958 = vmatpush3.bf16.msra.mxu0 %v3447_v7 }
 0x1c9   :  { %3003 = vmatprep.subr.bf16.mxu0 %v3658_v9 }
 0x1db   :  { %v1605_v16 = vpop.f32.mrf.mxu0 }
 0x1dc   :  { %v1606_v40 = vadd.f32 %v1605_v16, %v1563_v33 }
 0x1dd   :  { %v1607_v20 = vpop.f32.mrf.mxu0 }
 0x1de   :  { %v1608_v37 = vadd.f32 %v1607_v20, %v1565_v31  ;;  %v1781_v20 = vrot.slane %v1776_v17, %v354_v13  ;;  %v3452_v13 = vld [vmem:[#allocation11 + $0x18] sm:$0xff]  }
 0x1df   :  { %v1609_v28 = vpop.f32.mrf.mxu0 }
 0x1e0   :  { %v1610_v39 = vadd.f32 %v1609_v28, %v1567_v32 }
 0x1e1   :  { %v1611_v34 = vpop.f32.mrf.mxu0 }
 0x1e2   :  { %v1612_v45 = vadd.f32 %v1611_v34, %v1569_v36 }
 0x1e4   :  { %v1648_v22 = vpop.f32.mrf.mxu1 }
 0x1e5   :  { %v1649_v47 = vadd.f32 %v1648_v22, %v1606_v40 }
 0x1e6   :  { %v1650_v24 = vpop.f32.mrf.mxu1 }
 0x1e7   :  { %v1651_v54 = vadd.f32 %v1650_v24, %v1608_v37 }
 0x1e8   :  { %v1652_v29 = vpop.f32.mrf.mxu1 }
 0x1e9   :  { %v1653_v46 = vadd.f32 %v1652_v29, %v1610_v39 }
 0x1ea   :  { %v1654_v30 = vpop.f32.mrf.mxu1 }
 0x1eb   :  { %v1655_v26 = vadd.f32 %v1654_v30, %v1612_v45  ;;  %v3453_v45 = vld [vmem:[#allocation11 + $0x10] sm:$0xff]  }
 0x1ec   :  { %v1691_v35 = vpop.f32.mrf.mxu1 }
 0x1ed   :  { %v1692_v48 = vadd.f32 %v1691_v35, %v1649_v47  ;;  %v3456_v47 = vld [vmem:[#allocation13 + $0x38] sm:$0xff]  }
 0x1ee   :  { %v1693_v42 = vpop.f32.mrf.mxu1 }
 0x1ef   :  { %v1694_v43 = vadd.f32 %v1693_v42, %v1651_v54  ;;  %v1702_v56 = vmax.f32 %v1692_v48, 0.0  ;;  %v3454_v54 = vld [vmem:[#allocation11 + $0x8] sm:$0xff]  }
 0x1f0   :  { %v1695_v12 = vpop.f32.mrf.mxu1 }
 0x1f1   :  { %v1696_v21 = vadd.f32 %v1695_v12, %v1653_v46  ;;  %v1703_v53 = vmax.f32 %v1694_v43, 0.0  ;;  %v3455_v46 = vld [vmem:[#allocation11] sm:$0xff]   ;;  %v3457_v12 = vld [vmem:[#allocation13 + $0x30] sm:$0xff]  }
 0x1f2   :  { %v1697_v49 = vpop.f32.mrf.mxu1  ;;  %v3459_v43 = vld [vmem:[#allocation13 + $0x20] sm:$0xff]  }
 0x1f3   :  { %v1698_v50 = vadd.f32 %v1697_v49, %v1655_v26  ;;  %v1706_v44 = vmax.f32 %v1696_v21, 0.0  ;;  %v3458_v26 = vld [vmem:[#allocation13 + $0x28] sm:$0xff]   ;;  %v3460_v21 = vld [vmem:[#allocation13 + $0x18] sm:$0xff]  }
 0x1f5   :  { %v1707_v55 = vmax.f32 %v1698_v50, 0.0  ;;  %v1710_v60 = vpack.c.bf16 %v1706_v44, %v1702_v56 }
 0x1f7   :  { %v1711_v58 = vpack.c.bf16 %v1707_v55, %v1703_v53 }
 0x1f9   :  { %2183 = vmatprep.mubr.bf16.mxu1 %v1711_v58 }
 0x1fa   :  { %2184 = vmatmul.mubr.bf16.vlgmr.msra.gmra.mxu1 %v1710_v60  ;;  %v3462_v60 = vld [vmem:[#allocation13 + $0x8] sm:$0xff]  }
 0x1fb   :  { %2984 = vmatpush3.bf16.msra.mxu1 %v3448_v8  ;;  %2999 = vmatprep.mubr.msk.bf16.mxu1 %vm3659_vm1, %v3658_v9  ;;  %v2934_v8 = vld [vmem:[%s3846_s10] ss:$0 sm:$0xff] }
 0x1fc   :  { %2985 = vmatprep.subr.bf16.mxu1 %v3658_v9 }
 0x1ff   :  { %2986 = vmatpush3.bf16.msra.mxu1 %v3449_v10 }
 0x200   :  { %2987 = vmatprep.subr.bf16.mxu1 %v3658_v9 }
 0x203   :  { %2988 = vmatpush3.bf16.msra.mxu1 %v3450_v11 }
 0x204   :  { %2989 = vmatprep.subr.bf16.mxu1 %v3658_v9 }
 0x207   :  { %2990 = vmatpush3.bf16.msra.mxu1 %v3451_v14 }
 0x208   :  { %2991 = vmatprep.subr.bf16.mxu1 %v3658_v9 }
 0x20b   :  { %2992 = vmatpush3.bf16.msra.mxu1 %v3452_v13 }
 0x20c   :  { %2993 = vmatprep.subr.bf16.mxu1 %v3658_v9 }
 0x20f   :  { %2994 = vmatpush3.bf16.msra.mxu1 %v3453_v45 }
 0x210   :  { %2995 = vmatprep.subr.bf16.mxu1 %v3658_v9 }
 0x213   :  { %2996 = vmatpush3.bf16.msra.mxu1 %v3454_v54 }
 0x214   :  { %2997 = vmatprep.subr.bf16.mxu1 %v3658_v9 }
 0x217   :  { %2998 = vmatpush3.bf16.msra.mxu1 %v3455_v46 }
 0x26b   :  { %v2142_v15 = vpop.f32.mrf.mxu0 }
 0x26c   :  { %v2143_v29 = vadd.f32 %v2142_v15, %v1781_v20 }
 0x26d   :  { %v2144_v16 = vpop.f32.mrf.mxu0 }
 0x26e   :  { %v2145_v27 = vadd.f32 %v2144_v16, %v1785_v19 }
 0x26f   :  { %v2146_v18 = vpop.f32.mrf.mxu0 }
 0x270   :  { %v2147_v28 = vadd.f32 %v2146_v18, %v1781_v20 }
 0x271   :  { %v2148_v24 = vpop.f32.mrf.mxu0 }
 0x272   :  { %v2149_v31 = vadd.f32 %v2148_v24, %v1785_v19 }
 0x2ba   :  { %v2185_v22 = vpop.f32.mrf.mxu1 }
 0x2bb   :  { %v2186_v34 = vadd.f32 %v2185_v22, %v2143_v29 }
 0x2bc   :  { %v2187_v25 = vpop.f32.mrf.mxu1 }
 0x2bd   :  { %v2188_v32 = vadd.f32 %v2187_v25, %v2145_v27  ;;  %v2194_v41 = vmax.f32 %v2186_v34, 0.0 }
 0x2be   :  { %v2189_v30 = vpop.f32.mrf.mxu1 }
 0x2bf   :  { %v2190_v33 = vadd.f32 %v2189_v30, %v2147_v28  ;;  %v2195_v39 = vmax.f32 %v2188_v32, 0.0 }
 0x2c0   :  { %v2191_v35 = vpop.f32.mrf.mxu1 }
 0x2c1   :  { %v2192_v36 = vadd.f32 %v2191_v35, %v2149_v31  ;;  %v2196_v37 = vmax.f32 %v2190_v33, 0.0 }
 0x2c3   :  { %v2197_v40 = vmax.f32 %v2192_v36, 0.0  ;;  %v2198_v38 = vpack.c.bf16 %v2196_v37, %v2194_v41 }
 0x2c5   :  { %v2199_v42 = vpack.c.bf16 %v2197_v40, %v2195_v39 }
 0x2c7   :  { %2367 = vmatprep.mubr.bf16.mxu0 %v2199_v42 }
 0x2c8   :  { %2368 = vmatmul.mubr.bf16.vlgmr.msra.gmra.mxu0 %v2198_v38 }
 0x2c9   :  { %3019 = vmatprep.mubr.msk.bf16.mxu0 %vm3659_vm1, %v3658_v9  ;;  %3004 = vmatpush3.bf16.msra.mxu0 %v3456_v47 }
 0x2ca   :  { %3005 = vmatprep.subr.bf16.mxu0 %v3658_v9 }
 0x2cd   :  { %3006 = vmatpush3.bf16.msra.mxu0 %v3457_v12 }
 0x2ce   :  { %3007 = vmatprep.subr.bf16.mxu0 %v3658_v9 }
 0x2d1   :  { %3008 = vmatpush3.bf16.msra.mxu0 %v3458_v26 }
 0x2d2   :  { %3009 = vmatprep.subr.bf16.mxu0 %v3658_v9 }
 0x2d5   :  { %3010 = vmatpush3.bf16.msra.mxu0 %v3459_v43 }
 0x2d6   :  { %3011 = vmatprep.subr.bf16.mxu0 %v3658_v9 }
 0x2d9   :  { %3012 = vmatpush3.bf16.msra.mxu0 %v3460_v21 }
 0x2da   :  { %3013 = vmatprep.subr.bf16.mxu0 %v3658_v9 }
 0x2dd   :  { %3014 = vmatpush3.bf16.msra.mxu0 %v3461_v59 }
 0x2de   :  { %3015 = vmatprep.subr.bf16.mxu0 %v3658_v9 }
 0x2e1   :  { %3016 = vmatpush3.bf16.msra.mxu0 %v3462_v60 }
 0x2e2   :  { %3017 = vmatprep.subr.bf16.mxu0 %v3658_v9 }
 0x2e5   :  { %3018 = vmatpush3.bf16.msra.mxu0 %v3463_v61 }
 0x388   :  { %v2959_v48 = vpop.f32.mrf.mxu0 }
 0x38a   :  { %v2960_v49 = vpop.f32.mrf.mxu0 }
 0x38b   :  { %v2961_v50 = vadd.f32 %v2960_v49, %v2959_v48 }
 0x38c   :  { %v2962_v23 = vpop.f32.mrf.mxu0 }
 0x38d   :  { %v2370_v44 = vadd.f32 %v2961_v50, %v2908_v51 }
 0x38e   :  { %v2963_v52 = vpop.f32.mrf.mxu0 }
 0x38f   :  { %v2964_v53 = vadd.f32 %v2963_v52, %v2962_v23  ;;  %v2376_v56 = vmax.f32 %v2370_v44, 0.0 }
 0x391   :  { %v2373_v55 = vadd.f32 %v2964_v53, %v2908_v51 }
 0x393   :  { %v2377_v57 = vmax.f32 %v2373_v55, 0.0 }
 0x395   :  { %v2378_v58 = vpack.c.bf16 %v2377_v57, %v2376_v56 }
 0x397   :  { %3000 = vmatmul.mubr.bf16.vlgmr.msra.gmra.mxu1 %v2378_v58 }
 0x457   :  { %v2484_v63 = vpop.f32.mrf.mxu1 }
 0x458   :  { %v2485_v1 = vadd.f32 %v2925_v62, %v2484_v63 }
 0x459   :  { %v3001_v0 = vpop.f32.mrf.mxu1 }
 0x45a   :  { %v2491_v5 = vmax.f32 %v2485_v1, 0.0 }
 0x45b   :  { %v2487_v2 = vpop.f32.mrf.mxu1 }
 0x45c   :  { %v2488_v3 = vadd.f32 %v2925_v62, %v2487_v2 }
 0x45d   :  { %v3002_v4 = vpop.f32.mrf.mxu1 }
 0x45e   :  { %v2492_v6 = vmax.f32 %v2488_v3, 0.0 }
 0x460   :  { %v2493_v7 = vpack.c.bf16 %v2492_v6, %v2491_v5 }
 0x462   :  { %3020 = vmatmul.mubr.bf16.vlgmr.msra.gmra.mxu0 %v2493_v7 }
 0x522   :  { %v2599_v9 = vpop.f32.mrf.mxu0 }
 0x523   :  { %v2600_v10 = vadd.f32 %v2934_v8, %v2599_v9 }
 0x524   :  { %v3021_v11 = vpop.f32.mrf.mxu0 }
 0x525   :  { %2606 = vmax.xlane.f32.xlu0 %v2600_v10 }
 0x526   :  { %v2602_v14 = vpop.f32.mrf.mxu0 }
 0x527   :  { %v2603_v15 = vadd.f32 %v2934_v8, %v2602_v14 }
 0x528   :  { %v3022_v16 = vpop.f32.mrf.mxu0 }
 0x529   :  { %2608 = vmax.xlane.f32.xlu0 %v2603_v15 }
 0x5ae   :  { %v2607_v17 = vpop.xlane.xlu0 %2606 }
 0x5af   :  { %v2610_v18 = vsub.f32 %v2600_v10, %v2607_v17 }
 0x5b1   :  { %v2612_v19 = vmul.f32 1.442695, %v2610_v18 }
 0x5b2   :  { %v2609_v20 = vpop.xlane.xlu0 %2608 }
 0x5b3   :  { %3464 = vpow2.f32 %v2612_v19  ;;  %v2611_v22 = vsub.f32 %v2603_v15, %v2609_v20 }
 0x5b5   :  { %v2614_v24 = vmul.f32 1.442695, %v2611_v22 }
 0x5b7   :  { %3466 = vpow2.f32 %v2614_v24 }
 0x5c0   :  { %v3465_v25 = vpop.eup %3464 }
 0x5c1   :  { %2616 = vadd.xlane.f32.xlu1 %v3465_v25 }
 0x5c4   :  { %v3467_v27 = vpop.eup %3466 }
 0x5c5   :  { %2618 = vadd.xlane.f32.xlu1 %v3467_v27 }
 0x64a   :  { %v2617_v28 = vpop.xlane.xlu1 %2616 }
 0x64b   :  { %3468 = vrcp.f32 %v2617_v28 }
 0x64e   :  { %v2619_v29 = vpop.xlane.xlu1 %2618 }
 0x64f   :  { %3470 = vrcp.f32 %v2619_v29 }
 0x658   :  { %v3469_v30 = vpop.eup %3468 }
 0x659   :  { %v2622_v31 = vmul.f32 %v3469_v30, %v3465_v25 }
 0x65b   :  { %2624 = vst [vmem:[#allocation14] sm:$0xff] %v2622_v31 }
 0x65c   :  { %v3471_v32 = vpop.eup %3470 }
 0x65d   :  { %v2623_v33 = vmul.f32 %v3471_v32, %v3467_v27 }
 0x65f   :  { %2625 = vst [vmem:[#allocation14 + $0x8] sm:$0xff] %v2623_v33 }
 0x660   :  { %2630 = vsyncadd [#allocation4], 128  ;;  %s3660_s8 = smov [#allocation14]  }
 0x661   :  { %s2631_s10 = sshll.u32 %s3660_s8, 4  ;;  %s2632_s10 = int_to_ptr.vmem [resolvable:$true] %s2631_s10 }
 0x662   :  { %s3612_s22 = scalar_lea.vmem %s2632_s10, 128  ;;  %s3616_s23 = scalar_lea.vmem %s2632_s10, 256 }
 0x663   :  { %p3613_p7 = scmp.ne.s32.totalorder %s2632_s10, %s3612_s22  ;;  %p3617_p8 = scmp.lt.s32.totalorder %s2632_s10, %s2632_s10 }
 0x664   :  { %p3618_p9 = scmp.lt.s32.totalorder %s3616_s23, %s3612_s22 }
 0x666   :  { %p3619_p10 = por %p3618_p9, %p3617_p8 }
 0x668   :  { %p3620_p11 = pnand %p3619_p10, %p3613_p7 }
 0x66a   :  { %3623 = shalt.err (!%p3620_p11)
}
 0x66b   :  { %2637 = dma.vmem_to_hbm [thread:$0]  %s2632_s10, 128, %s3847_s11, [#allocation4], %s3646_s27, %s3646_s27, %s3647_s28  }
 0x66c   :  { %3640 = dma.done.wait [#allocation4], 256  }
 0x66d   :  { %3641 = vsyncadd [#allocation4], 4294967040 }
 0x66e   :  { %2641 = vsyncpa [#allocation3], 1 }
 0x66f   :  { %2642 = vsyncpa [#allocation6], 1 }
 0x670   :  { %2643 = vsyncpa [#allocation9], 1 }
 0x671   :  { %2644 = vsyncpa [#allocation12], 1 }
 0x672   :  { %2645 = vsyncpa [#allocation4], 1 }

</bundles_post_ra>
